<compile_context>
chip_gen: v6e
topology: v6e:2x2x1
jax: 0.10.0
libtpu: 0.0.40
codegen_flags: <defaults>
</compile_context>

<pallas_src>
import functools

import jax
import jax.numpy as jnp
from jax.experimental import pallas as pl
from jax.experimental.pallas import tpu as pltpu


# ----------------------------------------------------------------------------
# Fused flash-style kernel:
#   QKV projections + per-head online-softmax attention + output Linear.
# grid = (B, n_q_tiles, n_kv_tiles); KV axis is the reduction ("arbitrary").
# ----------------------------------------------------------------------------
def _mha_flash_kernel(x_ref, xkv_ref, wq_ref, wkv_ref, bias_ref, wo_ref,
                      out_ref, q_scr, m_scr, l_scr, acc_scr, *,
                      scale, num_heads, head_dim, compute_dtype, approx_recip):
    H, D = num_heads, head_dim
    HD = H * D
    cd = compute_dtype

    ki = pl.program_id(2)
    n_kv = pl.num_programs(2)

    biases = bias_ref[...]            # (4, E) rows: bq | bk | bv | bo (f32)
    bq = biases[0:1, :]
    bk = biases[1:2, :]
    bv = biases[2:3, :]
    bo = biases[3:4, :]

    # --- first KV tile for this (batch, q-tile): project Q, reset state ----
    @pl.when(ki == 0)
    def _init():
        x = x_ref[0]                                               # (TQ, E)
        q = jnp.dot(x.astype(cd), wq_ref[...],
                    preferred_element_type=jnp.float32) + bq       # (TQ, HD) f32
        # Apply the softmax scale once here instead of on every score tile.
        q_scr[...] = (q * scale).astype(cd)
        m_scr[...] = jnp.full_like(m_scr, -jnp.inf)
        l_scr[...] = jnp.zeros_like(l_scr)
        acc_scr[...] = jnp.zeros_like(acc_scr)

    # --- K/V projection for this KV tile (f32 accum, one cast to cd) -------
    xkv = xkv_ref[0]                                               # (TKV, E)
    kv = jnp.dot(xkv.astype(cd), wkv_ref[...],
                 preferred_element_type=jnp.float32)               # (TKV, 2HD)
    k = (kv[:, :HD] + bk).astype(cd)                               # (TKV, HD)
    v = (kv[:, HD:] + bv).astype(cd)                               # (TKV, HD)
    q = q_scr[...]                                                 # (TQ, HD) cd

    # --- per-head online softmax over this KV tile (H is small & static) ---
    # TODO(synk): for large H switch to lax.fori_loop(unroll=True) with
    # pl.ds head slices to bound vreg live ranges.
    for h in range(H):
        sl = slice(h * D, (h + 1) * D)
        qh = q[:, sl]                                              # (TQ, D)
        kh = k[:, sl]                                              # (TKV, D)
        vh = v[:, sl]                                              # (TKV, D)

        # Q @ K^T without an explicit XLU transpose: contract last dims.
        s = jax.lax.dot_general(qh, kh, (((1,), (1,)), ((), ())),
                                preferred_element_type=jnp.float32)  # (TQ, TKV)

        m_prev = m_scr[:, h:h + 1]
        l_prev = l_scr[:, h:h + 1]
        m_new = jnp.maximum(m_prev, jnp.max(s, axis=-1, keepdims=True))
        alpha = jnp.exp(m_prev - m_new)
        p = jnp.exp(s - m_new)                                     # f32
        l_scr[:, h:h + 1] = alpha * l_prev + jnp.sum(p, axis=-1, keepdims=True)
        m_scr[:, h:h + 1] = m_new
        acc_scr[:, sl] = alpha * acc_scr[:, sl] + jnp.dot(
            p.astype(cd), vh, preferred_element_type=jnp.float32)

    # --- last KV tile: normalize, fuse output Linear, write lane-dense -----
    @pl.when(ki == n_kv - 1)
    def _finalize():
        for h in range(H):
            sl = slice(h * D, (h + 1) * D)
            l_h = l_scr[:, h:h + 1]
            inv = pl.reciprocal(l_h, approx=True) if approx_recip else 1.0 / l_h
            acc_scr[:, sl] = acc_scr[:, sl] * inv
        o_flat = acc_scr[...].astype(cd)                           # (TQ, HD)
        y = jnp.dot(o_flat, wo_ref[...],
                    preferred_element_type=jnp.float32) + bo       # (TQ, E)
        out_ref[0] = y.astype(out_ref.dtype)


def _pick_tile(dim, cap):
    """Largest tile <= cap that divides `dim` and satisfies the (8,128) rule
    on the second-minor axis (multiple of 8, or the full dimension)."""
    if dim <= cap:
        return dim
    for t in range(min(cap, dim), 0, -1):
        if dim % t == 0 and (t % 8 == 0):
            return t
    return dim  # full dim is always legal


def multi_head_attention(x, params, x_kv=None, *, scaled=True,
                         compute_dtype=jnp.bfloat16, approx_reciprocal=True,
                         q_tile_cap=256, kv_tile_cap=512):
    """x: (B, S, E) f32. params: stacked per-head weights + output layer.

    Matches MultiHeadAttention.forward (mask=None path).
    """
    if x_kv is None:
        x_kv = x  # self-attention; the q-tile/kv-tile BlockSpecs differ, so
        # the array is intentionally passed for both operands.

    B, S, E = x.shape
    S_kv = x_kv.shape[1]
    wq = params["wq"]                      # (H, E, D)
    H, E_w, D = wq.shape
    assert E_w == E
    HD = H * D
    assert HD == E, "embedded_dim must be divisible by num_heads (HD == E)"
    scale = (1.0 / float(D) ** 0.5) if scaled else 1.0
    cd = compute_dtype

    # Fuse head-stacked weights into lane-dense matrices, cast to compute
    # dtype in the wrapper (cheap, one-time; halves weight DMA for bf16).
    wq_f = jnp.transpose(wq, (1, 0, 2)).reshape(E, HD).astype(cd)        # (E, HD)
    wk_f = jnp.transpose(params["wk"], (1, 0, 2)).reshape(E, HD)
    wv_f = jnp.transpose(params["wv"], (1, 0, 2)).reshape(E, HD)
    wkv_f = jnp.concatenate([wk_f, wv_f], axis=-1).astype(cd)            # (E, 2HD)
    wo_f = params["wo_t"].astype(cd)                                     # (E, E)

    # Biases stay f32 (added to the f32 MXU accumulators); packed -> one DMA.
    bias_pack = jnp.stack([params["bq"].reshape(HD),
                           params["bk"].reshape(HD),
                           params["bv"].reshape(HD),
                           params["bo"].reshape(E)], axis=0)             # (4, E)

    TQ = _pick_tile(S, q_tile_cap)
    TKV = _pick_tile(S_kv, kv_tile_cap)
    n_q, n_kv = S // TQ, S_kv // TKV

    kernel = functools.partial(_mha_flash_kernel, scale=scale, num_heads=H,
                               head_dim=D, compute_dtype=cd,
                               approx_recip=approx_reciprocal)

    # VMEM budget derived from the actual block footprint (+headroom).
    w_item = jnp.dtype(cd).itemsize
    a_item = x.dtype.itemsize
    weight_bytes = (E * HD + E * 2 * HD + E * E) * w_item + 4 * E * 4
    act_bytes = 2 * (TQ * E + TKV * E + TQ * E) * a_item       # double-buffered
    scratch_bytes = TQ * HD * w_item + 2 * TQ * H * 4 + TQ * HD * 4
    score_bytes = 3 * TQ * TKV * 4                              # s / p / temps
    footprint = weight_bytes + act_bytes + scratch_bytes + score_bytes
    vmem_limit = int(min(64 * 2 ** 20, max(32 * 2 ** 20, 2 * footprint)))

    def _const_spec(shape):
        # Constant index_map -> DMA'd once; single-buffer to halve VMEM use.
        return pl.BlockSpec(shape, lambda b, qi, ki: (0, 0),
                            pipeline_mode=pl.Buffered(1))

    out = pl.pallas_call(
        kernel,
        out_shape=jax.ShapeDtypeStruct((B, S, E), x.dtype),
        grid_spec=pltpu.PrefetchScalarGridSpec(
            num_scalar_prefetch=0,
            grid=(B, n_q, n_kv),
            in_specs=[
                pl.BlockSpec((1, TQ, E), lambda b, qi, ki: (b, qi, 0)),   # x
                pl.BlockSpec((1, TKV, E), lambda b, qi, ki: (b, ki, 0)),  # x_kv
                _const_spec((E, HD)),          # Wq fused (cd)
                _const_spec((E, 2 * HD)),      # Wk|Wv fused (cd)
                _const_spec((4, E)),           # packed biases (f32)
                _const_spec((E, E)),           # Wo (pre-transposed, cd)
            ],
            out_specs=pl.BlockSpec((1, TQ, E), lambda b, qi, ki: (b, qi, 0)),
            scratch_shapes=[
                pltpu.VMEM((TQ, HD), cd),            # scaled Q tile
                pltpu.VMEM((TQ, H), jnp.float32),    # running max per head
                pltpu.VMEM((TQ, H), jnp.float32),    # running sum per head
                pltpu.VMEM((TQ, HD), jnp.float32),   # running PV accumulator
            ],
        ),
        compiler_params=pltpu.CompilerParams(
            dimension_semantics=("parallel", "parallel", "arbitrary"),
            vmem_limit_bytes=vmem_limit),
    )(x, x_kv, wq_f, wkv_f, bias_pack, wo_f)

    return out


def init_params(key, embedded_dim, num_heads):
    """Deterministic synthetic parameters (same shapes as the PyTorch module)."""
    head_dim = embedded_dim // num_heads
    ks = jax.random.split(key, 8)
    shape_w = (num_heads, embedded_dim, head_dim)
    shape_b = (num_heads, head_dim)
    return {
        "wq": jax.random.normal(ks[0], shape_w, jnp.float32) * 0.1,
        "bq": jax.random.normal(ks[1], shape_b, jnp.float32) * 0.1,
        "wk": jax.random.normal(ks[2], shape_w, jnp.float32) * 0.1,
        "bk": jax.random.normal(ks[3], shape_b, jnp.float32) * 0.1,
        "wv": jax.random.normal(ks[4], shape_w, jnp.float32) * 0.1,
        "bv": jax.random.normal(ks[5], shape_b, jnp.float32) * 0.1,
        # nn.Linear(E, E): weight (E_out, E_in); stored transposed: y = x @ W_t + b
        "wo_t": jax.random.normal(ks[6], (embedded_dim, embedded_dim),
                                  jnp.float32) * 0.1,
        "bo": jax.random.normal(ks[7], (1, embedded_dim), jnp.float32) * 0.1,
    }


def reference(x, params, x_kv=None, *, scaled=True):
    """Pure-JAX reference mirroring the PyTorch module semantics."""
    if x_kv is None:
        x_kv = x
    H, E, D = params["wq"].shape
    scale = (1.0 / float(D) ** 0.5) if scaled else 1.0
    head_outs = []
    for h in range(H):
        q = x @ params["wq"][h] + params["bq"][h]
        k = x_kv @ params["wk"][h] + params["bk"][h]
        v = x_kv @ params["wv"][h] + params["bv"][h]
        s = jnp.einsum("bqd,bkd->bqk", q, k) * scale
        a = jax.nn.softmax(s, axis=-1)
        head_outs.append(jnp.einsum("bqk,bkd->bqd", a, v))
    concat = jnp.concatenate(head_outs, axis=-1)
    return concat @ params["wo_t"] + params["bo"]


if __name__ == "__main__":
    B, S, E, H = 2, 8, 32, 8     # embedded_dim=32, num_heads=8 -> head_dim=4
    key = jax.random.PRNGKey(0)
    kx, kkv, kp = jax.random.split(key, 3)
    x = jax.random.normal(kx, (B, S, E), jnp.float32)
    params = init_params(kp, E, H)

    # 1) Default fast path: bf16 MXU feeds, f32 accum/softmax, EUP reciprocal.
    out_bf16 = jax.block_until_ready(multi_head_attention(x, params))
    ref_self = reference(x, params)
    assert out_bf16.shape == (B, S, E)
    assert jnp.allclose(out_bf16, ref_self, atol=5e-2, rtol=5e-2)

    # 2) Accuracy path: f32 compute, exact reciprocal.
    out_f32 = jax.block_until_ready(
        multi_head_attention(x, params, compute_dtype=jnp.float32,
                             approx_reciprocal=False))
    assert jnp.allclose(out_f32, ref_self, atol=1e-4, rtol=1e-4)

    # 3) Cross-attention with multiple KV tiles to exercise the online softmax.
    S_kv = 16
    x_kv = jax.random.normal(kkv, (B, S_kv, E), jnp.float32)
    out_x = jax.block_until_ready(
        multi_head_attention(x, params, x_kv, compute_dtype=jnp.float32,
                             approx_reciprocal=False, kv_tile_cap=8))
    ref_x = reference(x, params, x_kv)
    assert jnp.allclose(out_x, ref_x, atol=1e-4, rtol=1e-4)

    print("KERNEL_OK")
</pallas_src>

<mosaic_0001>
module attributes {stable_mosaic.version = 11 : i64} {
  func.func @_mha_flash_kernel(%arg0: i32, %arg1: i32, %arg2: i32, %arg3: memref<1x8x32xf32, #tpu.memory_space<vmem>>, %arg4: memref<1x8x32xf32, #tpu.memory_space<vmem>>, %arg5: memref<32x32xbf16, #tpu.memory_space<vmem>>, %arg6: memref<32x64xbf16, #tpu.memory_space<vmem>>, %arg7: memref<4x32xf32, #tpu.memory_space<vmem>>, %arg8: memref<32x32xbf16, #tpu.memory_space<vmem>>, %arg9: memref<1x8x32xf32, #tpu.memory_space<vmem>>, %arg10: memref<8x32xbf16, #tpu.memory_space<vmem>>, %arg11: memref<8x8xf32, #tpu.memory_space<vmem>>, %arg12: memref<8x8xf32, #tpu.memory_space<vmem>>, %arg13: memref<8x32xf32, #tpu.memory_space<vmem>>) attributes {dimension_semantics = [#tpu.dimension_semantics<parallel>, #tpu.dimension_semantics<parallel>, #tpu.dimension_semantics<arbitrary>], iteration_bounds = array<i64: 2, 1, 1>, scalar_prefetch = 0 : i64, scratch_operands = 4 : i64, tpu.core_type = #tpu.core_type<tc>, window_params = [{transform_indices = @transform_0, window_bounds = array<i64: 1, 8, 32>}, {transform_indices = @transform_1, window_bounds = array<i64: 1, 8, 32>}, {pipeline_mode = #tpu.pipeline_mode<synchronous>, transform_indices = @transform_2, window_bounds = array<i64: 32, 32>}, {pipeline_mode = #tpu.pipeline_mode<synchronous>, transform_indices = @transform_3, window_bounds = array<i64: 32, 64>}, {pipeline_mode = #tpu.pipeline_mode<synchronous>, transform_indices = @transform_4, window_bounds = array<i64: 4, 32>}, {pipeline_mode = #tpu.pipeline_mode<synchronous>, transform_indices = @transform_5, window_bounds = array<i64: 32, 32>}, {transform_indices = @transform_6, window_bounds = array<i64: 1, 8, 32>}]} {
    %c0 = arith.constant 0 : index
    %c0_0 = arith.constant 0 : index
    %0 = vector.load %arg7[%c0, %c0_0] : memref<4x32xf32, #tpu.memory_space<vmem>>, vector<4x32xf32>
    %1 = vector.extract_strided_slice %0 {offsets = [0, 0], sizes = [1, 32], strides = [1, 1]} : vector<4x32xf32> to vector<1x32xf32>
    %2 = vector.extract_strided_slice %0 {offsets = [1, 0], sizes = [1, 32], strides = [1, 1]} : vector<4x32xf32> to vector<1x32xf32>
    %3 = vector.extract_strided_slice %0 {offsets = [2, 0], sizes = [1, 32], strides = [1, 1]} : vector<4x32xf32> to vector<1x32xf32>
    %4 = vector.extract_strided_slice %0 {offsets = [3, 0], sizes = [1, 32], strides = [1, 1]} : vector<4x32xf32> to vector<1x32xf32>
    %c0_i32 = arith.constant 0 : i32
    %5 = arith.cmpi eq, %arg2, %c0_i32 : i32
    %6 = arith.extui %5 : i1 to i32
    %c0_i32_1 = arith.constant 0 : i32
    %7 = arith.cmpi ne, %6, %c0_i32_1 : i32
    scf.if %7 {
      %c0_126 = arith.constant 0 : index
      %c0_127 = arith.constant 0 : index
      %c0_128 = arith.constant 0 : index
      %241 = vector.load %arg3[%c0_126, %c0_127, %c0_128] : memref<1x8x32xf32, #tpu.memory_space<vmem>>, vector<1x8x32xf32>
      %242 = vector.shape_cast %241 : vector<1x8x32xf32> to vector<8x32xf32>
      %243 = arith.truncf %242 : vector<8x32xf32> to vector<8x32xbf16>
      %c0_129 = arith.constant 0 : index
      %c0_130 = arith.constant 0 : index
      %244 = vector.load %arg5[%c0_129, %c0_130] : memref<32x32xbf16, #tpu.memory_space<vmem>>, vector<32x32xbf16>
      %cst_131 = arith.constant dense<0.000000e+00> : vector<8x32xf32>
      %245 = tpu.matmul %243, %244, %cst_131 {dimension_numbers = #tpu.dot_dimension_numbers<[1], [0], [0], [1], [0, 0, 1, 1], [], []>} : vector<8x32xbf16>, vector<32x32xbf16>, vector<8x32xf32> -> vector<8x32xf32>
      %246 = vector.broadcast %1 : vector<1x32xf32> to vector<8x32xf32>
      %247 = arith.addf %245, %246 : vector<8x32xf32>
      %cst_132 = arith.constant 5.000000e-01 : f32
      %248 = vector.broadcast %cst_132 : f32 to vector<8x32xf32>
      %249 = arith.mulf %247, %248 : vector<8x32xf32>
      %250 = arith.truncf %249 : vector<8x32xf32> to vector<8x32xbf16>
      %c0_133 = arith.constant 0 : index
      %c0_134 = arith.constant 0 : index
      %251 = vector.load %arg10[%c0_133, %c0_134] : memref<8x32xbf16, #tpu.memory_space<vmem>>, vector<8x32xbf16>
      tpu.vector_store %arg10[%c0_133, %c0_134], %250 {strides = array<i32>} : memref<8x32xbf16, #tpu.memory_space<vmem>>, vector<8x32xbf16>,
      %cst_135 = arith.constant 0xFF800000 : f32
      %252 = vector.broadcast %cst_135 : f32 to vector<8x8xf32>
      %c0_136 = arith.constant 0 : index
      %c0_137 = arith.constant 0 : index
      %253 = vector.load %arg11[%c0_136, %c0_137] : memref<8x8xf32, #tpu.memory_space<vmem>>, vector<8x8xf32>
      tpu.vector_store %arg11[%c0_136, %c0_137], %252 {strides = array<i32>} : memref<8x8xf32, #tpu.memory_space<vmem>>, vector<8x8xf32>,
      %cst_138 = arith.constant 0.000000e+00 : f32
      %254 = vector.broadcast %cst_138 : f32 to vector<8x8xf32>
      %c0_139 = arith.constant 0 : index
      %c0_140 = arith.constant 0 : index
      %255 = vector.load %arg12[%c0_139, %c0_140] : memref<8x8xf32, #tpu.memory_space<vmem>>, vector<8x8xf32>
      tpu.vector_store %arg12[%c0_139, %c0_140], %254 {strides = array<i32>} : memref<8x8xf32, #tpu.memory_space<vmem>>, vector<8x8xf32>,
      %cst_141 = arith.constant 0.000000e+00 : f32
      %256 = vector.broadcast %cst_141 : f32 to vector<8x32xf32>
      %c0_142 = arith.constant 0 : index
      %c0_143 = arith.constant 0 : index
      %257 = vector.load %arg13[%c0_142, %c0_143] : memref<8x32xf32, #tpu.memory_space<vmem>>, vector<8x32xf32>
      tpu.vector_store %arg13[%c0_142, %c0_143], %256 {strides = array<i32>} : memref<8x32xf32, #tpu.memory_space<vmem>>, vector<8x32xf32>,
    } else {
    }
    %c0_2 = arith.constant 0 : index
    %c0_3 = arith.constant 0 : index
    %c0_4 = arith.constant 0 : index
    %8 = vector.load %arg4[%c0_2, %c0_3, %c0_4] : memref<1x8x32xf32, #tpu.memory_space<vmem>>, vector<1x8x32xf32>
    %9 = vector.shape_cast %8 : vector<1x8x32xf32> to vector<8x32xf32>
    %10 = arith.truncf %9 : vector<8x32xf32> to vector<8x32xbf16>
    %c0_5 = arith.constant 0 : index
    %c0_6 = arith.constant 0 : index
    %11 = vector.load %arg6[%c0_5, %c0_6] : memref<32x64xbf16, #tpu.memory_space<vmem>>, vector<32x64xbf16>
    %cst = arith.constant dense<0.000000e+00> : vector<8x64xf32>
    %12 = tpu.matmul %10, %11, %cst {dimension_numbers = #tpu.dot_dimension_numbers<[1], [0], [0], [1], [0, 0, 1, 1], [], []>} : vector<8x32xbf16>, vector<32x64xbf16>, vector<8x64xf32> -> vector<8x64xf32>
    %13 = vector.extract_strided_slice %12 {offsets = [0, 0], sizes = [8, 32], strides = [1, 1]} : vector<8x64xf32> to vector<8x32xf32>
    %14 = vector.broadcast %2 : vector<1x32xf32> to vector<8x32xf32>
    %15 = arith.addf %13, %14 : vector<8x32xf32>
    %16 = arith.truncf %15 : vector<8x32xf32> to vector<8x32xbf16>
    %17 = vector.extract_strided_slice %12 {offsets = [0, 32], sizes = [8, 32], strides = [1, 1]} : vector<8x64xf32> to vector<8x32xf32>
    %18 = vector.broadcast %3 : vector<1x32xf32> to vector<8x32xf32>
    %19 = arith.addf %17, %18 : vector<8x32xf32>
    %20 = arith.truncf %19 : vector<8x32xf32> to vector<8x32xbf16>
    %c0_7 = arith.constant 0 : index
    %c0_8 = arith.constant 0 : index
    %21 = vector.load %arg10[%c0_7, %c0_8] : memref<8x32xbf16, #tpu.memory_space<vmem>>, vector<8x32xbf16>
    %22 = vector.extract_strided_slice %21 {offsets = [0, 0], sizes = [8, 4], strides = [1, 1]} : vector<8x32xbf16> to vector<8x4xbf16>
    %23 = vector.extract_strided_slice %16 {offsets = [0, 0], sizes = [8, 4], strides = [1, 1]} : vector<8x32xbf16> to vector<8x4xbf16>
    %24 = vector.extract_strided_slice %20 {offsets = [0, 0], sizes = [8, 4], strides = [1, 1]} : vector<8x32xbf16> to vector<8x4xbf16>
    %cst_9 = arith.constant dense<0.000000e+00> : vector<8x8xf32>
    %25 = tpu.matmul %22, %23, %cst_9 {dimension_numbers = #tpu.dot_dimension_numbers<[1], [1], [0], [0], [0, 0, 1, 0], [], []>} : vector<8x4xbf16>, vector<8x4xbf16>, vector<8x8xf32> -> vector<8x8xf32>
    %c0_10 = arith.constant 0 : index
    %c0_11 = arith.constant 0 : index
    %26 = vector.load %arg11[%c0_10, %c0_11] : memref<8x8xf32, #tpu.memory_space<vmem>>, vector<8x1xf32>
    %c0_12 = arith.constant 0 : index
    %c0_13 = arith.constant 0 : index
    %27 = vector.load %arg12[%c0_12, %c0_13] : memref<8x8xf32, #tpu.memory_space<vmem>>, vector<8x1xf32>
    %cst_14 = arith.constant dense<0xFF800000> : vector<8xf32>
    %28 = vector.multi_reduction <maximumf>, %25, %cst_14 [1] : vector<8x8xf32> to vector<8xf32>
    %29 = vector.shape_cast %28 : vector<8xf32> to vector<8x1xf32>
    %30 = arith.maximumf %26, %29 : vector<8x1xf32>
    %31 = arith.subf %26, %30 : vector<8x1xf32>
    %32 = math.exp %31 : vector<8x1xf32>
    %33 = vector.broadcast %30 : vector<8x1xf32> to vector<8x8xf32>
    %34 = arith.subf %25, %33 : vector<8x8xf32>
    %35 = math.exp %34 : vector<8x8xf32>
    %36 = arith.mulf %32, %27 : vector<8x1xf32>
    %cst_15 = arith.constant dense<0.000000e+00> : vector<8xf32>
    %37 = vector.multi_reduction <add>, %35, %cst_15 [1] : vector<8x8xf32> to vector<8xf32>
    %38 = vector.shape_cast %37 : vector<8xf32> to vector<8x1xf32>
    %39 = arith.addf %36, %38 : vector<8x1xf32>
    %c0_16 = arith.constant 0 : index
    %c0_17 = arith.constant 0 : index
    %40 = vector.load %arg12[%c0_16, %c0_17] : memref<8x8xf32, #tpu.memory_space<vmem>>, vector<8x1xf32>
    tpu.vector_store %arg12[%c0_16, %c0_17], %39 {strides = array<i32>} : memref<8x8xf32, #tpu.memory_space<vmem>>, vector<8x1xf32>,
    %c0_18 = arith.constant 0 : index
    %c0_19 = arith.constant 0 : index
    %41 = vector.load %arg11[%c0_18, %c0_19] : memref<8x8xf32, #tpu.memory_space<vmem>>, vector<8x1xf32>
    tpu.vector_store %arg11[%c0_18, %c0_19], %30 {strides = array<i32>} : memref<8x8xf32, #tpu.memory_space<vmem>>, vector<8x1xf32>,
    %c0_20 = arith.constant 0 : index
    %c0_21 = arith.constant 0 : index
    %42 = vector.load %arg13[%c0_20, %c0_21] : memref<8x32xf32, #tpu.memory_space<vmem>>, vector<8x4xf32>
    %43 = vector.broadcast %32 : vector<8x1xf32> to vector<8x4xf32>
    %44 = arith.mulf %43, %42 : vector<8x4xf32>
    %45 = arith.truncf %35 : vector<8x8xf32> to vector<8x8xbf16>
    %cst_22 = arith.constant dense<0.000000e+00> : vector<8x4xf32>
    %46 = tpu.matmul %45, %24, %cst_22 {dimension_numbers = #tpu.dot_dimension_numbers<[1], [0], [0], [1], [0, 0, 1, 1], [], []>} : vector<8x8xbf16>, vector<8x4xbf16>, vector<8x4xf32> -> vector<8x4xf32>
    %47 = arith.addf %44, %46 : vector<8x4xf32>
    %c0_23 = arith.constant 0 : index
    %c0_24 = arith.constant 0 : index
    %48 = vector.load %arg13[%c0_23, %c0_24] : memref<8x32xf32, #tpu.memory_space<vmem>>, vector<8x4xf32>
    tpu.vector_store %arg13[%c0_23, %c0_24], %47 {strides = array<i32>} : memref<8x32xf32, #tpu.memory_space<vmem>>, vector<8x4xf32>,
    %49 = vector.extract_strided_slice %21 {offsets = [0, 4], sizes = [8, 4], strides = [1, 1]} : vector<8x32xbf16> to vector<8x4xbf16>
    %50 = vector.extract_strided_slice %16 {offsets = [0, 4], sizes = [8, 4], strides = [1, 1]} : vector<8x32xbf16> to vector<8x4xbf16>
    %51 = vector.extract_strided_slice %20 {offsets = [0, 4], sizes = [8, 4], strides = [1, 1]} : vector<8x32xbf16> to vector<8x4xbf16>
    %cst_25 = arith.constant dense<0.000000e+00> : vector<8x8xf32>
    %52 = tpu.matmul %49, %50, %cst_25 {dimension_numbers = #tpu.dot_dimension_numbers<[1], [1], [0], [0], [0, 0, 1, 0], [], []>} : vector<8x4xbf16>, vector<8x4xbf16>, vector<8x8xf32> -> vector<8x8xf32>
    %c0_26 = arith.constant 0 : index
    %c1 = arith.constant 1 : index
    %53 = vector.load %arg11[%c0_26, %c1] : memref<8x8xf32, #tpu.memory_space<vmem>>, vector<8x1xf32>
    %c0_27 = arith.constant 0 : index
    %c1_28 = arith.constant 1 : index
    %54 = vector.load %arg12[%c0_27, %c1_28] : memref<8x8xf32, #tpu.memory_space<vmem>>, vector<8x1xf32>
    %cst_29 = arith.constant dense<0xFF800000> : vector<8xf32>
    %55 = vector.multi_reduction <maximumf>, %52, %cst_29 [1] : vector<8x8xf32> to vector<8xf32>
    %56 = vector.shape_cast %55 : vector<8xf32> to vector<8x1xf32>
    %57 = arith.maximumf %53, %56 : vector<8x1xf32>
    %58 = arith.subf %53, %57 : vector<8x1xf32>
    %59 = math.exp %58 : vector<8x1xf32>
    %60 = vector.broadcast %57 : vector<8x1xf32> to vector<8x8xf32>
    %61 = arith.subf %52, %60 : vector<8x8xf32>
    %62 = math.exp %61 : vector<8x8xf32>
    %63 = arith.mulf %59, %54 : vector<8x1xf32>
    %cst_30 = arith.constant dense<0.000000e+00> : vector<8xf32>
    %64 = vector.multi_reduction <add>, %62, %cst_30 [1] : vector<8x8xf32> to vector<8xf32>
    %65 = vector.shape_cast %64 : vector<8xf32> to vector<8x1xf32>
    %66 = arith.addf %63, %65 : vector<8x1xf32>
    %c0_31 = arith.constant 0 : index
    %c1_32 = arith.constant 1 : index
    %67 = vector.load %arg12[%c0_31, %c1_32] : memref<8x8xf32, #tpu.memory_space<vmem>>, vector<8x1xf32>
    tpu.vector_store %arg12[%c0_31, %c1_32], %66 {strides = array<i32>} : memref<8x8xf32, #tpu.memory_space<vmem>>, vector<8x1xf32>,
    %c0_33 = arith.constant 0 : index
    %c1_34 = arith.constant 1 : index
    %68 = vector.load %arg11[%c0_33, %c1_34] : memref<8x8xf32, #tpu.memory_space<vmem>>, vector<8x1xf32>
    tpu.vector_store %arg11[%c0_33, %c1_34], %57 {strides = array<i32>} : memref<8x8xf32, #tpu.memory_space<vmem>>, vector<8x1xf32>,
    %c0_35 = arith.constant 0 : index
    %c4 = arith.constant 4 : index
    %69 = vector.load %arg13[%c0_35, %c4] : memref<8x32xf32, #tpu.memory_space<vmem>>, vector<8x4xf32>
    %70 = vector.broadcast %59 : vector<8x1xf32> to vector<8x4xf32>
    %71 = arith.mulf %70, %69 : vector<8x4xf32>
    %72 = arith.truncf %62 : vector<8x8xf32> to vector<8x8xbf16>
    %cst_36 = arith.constant dense<0.000000e+00> : vector<8x4xf32>
    %73 = tpu.matmul %72, %51, %cst_36 {dimension_numbers = #tpu.dot_dimension_numbers<[1], [0], [0], [1], [0, 0, 1, 1], [], []>} : vector<8x8xbf16>, vector<8x4xbf16>, vector<8x4xf32> -> vector<8x4xf32>
    %74 = arith.addf %71, %73 : vector<8x4xf32>
    %c0_37 = arith.constant 0 : index
    %c4_38 = arith.constant 4 : index
    %75 = vector.load %arg13[%c0_37, %c4_38] : memref<8x32xf32, #tpu.memory_space<vmem>>, vector<8x4xf32>
    tpu.vector_store %arg13[%c0_37, %c4_38], %74 {strides = array<i32>} : memref<8x32xf32, #tpu.memory_space<vmem>>, vector<8x4xf32>,
    %76 = vector.extract_strided_slice %21 {offsets = [0, 8], sizes = [8, 4], strides = [1, 1]} : vector<8x32xbf16> to vector<8x4xbf16>
    %77 = vector.extract_strided_slice %16 {offsets = [0, 8], sizes = [8, 4], strides = [1, 1]} : vector<8x32xbf16> to vector<8x4xbf16>
    %78 = vector.extract_strided_slice %20 {offsets = [0, 8], sizes = [8, 4], strides = [1, 1]} : vector<8x32xbf16> to vector<8x4xbf16>
    %cst_39 = arith.constant dense<0.000000e+00> : vector<8x8xf32>
    %79 = tpu.matmul %76, %77, %cst_39 {dimension_numbers = #tpu.dot_dimension_numbers<[1], [1], [0], [0], [0, 0, 1, 0], [], []>} : vector<8x4xbf16>, vector<8x4xbf16>, vector<8x8xf32> -> vector<8x8xf32>
    %c0_40 = arith.constant 0 : index
    %c2 = arith.constant 2 : index
    %80 = vector.load %arg11[%c0_40, %c2] : memref<8x8xf32, #tpu.memory_space<vmem>>, vector<8x1xf32>
    %c0_41 = arith.constant 0 : index
    %c2_42 = arith.constant 2 : index
    %81 = vector.load %arg12[%c0_41, %c2_42] : memref<8x8xf32, #tpu.memory_space<vmem>>, vector<8x1xf32>
    %cst_43 = arith.constant dense<0xFF800000> : vector<8xf32>
    %82 = vector.multi_reduction <maximumf>, %79, %cst_43 [1] : vector<8x8xf32> to vector<8xf32>
    %83 = vector.shape_cast %82 : vector<8xf32> to vector<8x1xf32>
    %84 = arith.maximumf %80, %83 : vector<8x1xf32>
    %85 = arith.subf %80, %84 : vector<8x1xf32>
    %86 = math.exp %85 : vector<8x1xf32>
    %87 = vector.broadcast %84 : vector<8x1xf32> to vector<8x8xf32>
    %88 = arith.subf %79, %87 : vector<8x8xf32>
    %89 = math.exp %88 : vector<8x8xf32>
    %90 = arith.mulf %86, %81 : vector<8x1xf32>
    %cst_44 = arith.constant dense<0.000000e+00> : vector<8xf32>
    %91 = vector.multi_reduction <add>, %89, %cst_44 [1] : vector<8x8xf32> to vector<8xf32>
    %92 = vector.shape_cast %91 : vector<8xf32> to vector<8x1xf32>
    %93 = arith.addf %90, %92 : vector<8x1xf32>
    %c0_45 = arith.constant 0 : index
    %c2_46 = arith.constant 2 : index
    %94 = vector.load %arg12[%c0_45, %c2_46] : memref<8x8xf32, #tpu.memory_space<vmem>>, vector<8x1xf32>
    tpu.vector_store %arg12[%c0_45, %c2_46], %93 {strides = array<i32>} : memref<8x8xf32, #tpu.memory_space<vmem>>, vector<8x1xf32>,
    %c0_47 = arith.constant 0 : index
    %c2_48 = arith.constant 2 : index
    %95 = vector.load %arg11[%c0_47, %c2_48] : memref<8x8xf32, #tpu.memory_space<vmem>>, vector<8x1xf32>
    tpu.vector_store %arg11[%c0_47, %c2_48], %84 {strides = array<i32>} : memref<8x8xf32, #tpu.memory_space<vmem>>, vector<8x1xf32>,
    %c0_49 = arith.constant 0 : index
    %c8 = arith.constant 8 : index
    %96 = vector.load %arg13[%c0_49, %c8] : memref<8x32xf32, #tpu.memory_space<vmem>>, vector<8x4xf32>
    %97 = vector.broadcast %86 : vector<8x1xf32> to vector<8x4xf32>
    %98 = arith.mulf %97, %96 : vector<8x4xf32>
    %99 = arith.truncf %89 : vector<8x8xf32> to vector<8x8xbf16>
    %cst_50 = arith.constant dense<0.000000e+00> : vector<8x4xf32>
    %100 = tpu.matmul %99, %78, %cst_50 {dimension_numbers = #tpu.dot_dimension_numbers<[1], [0], [0], [1], [0, 0, 1, 1], [], []>} : vector<8x8xbf16>, vector<8x4xbf16>, vector<8x4xf32> -> vector<8x4xf32>
    %101 = arith.addf %98, %100 : vector<8x4xf32>
    %c0_51 = arith.constant 0 : index
    %c8_52 = arith.constant 8 : index
    %102 = vector.load %arg13[%c0_51, %c8_52] : memref<8x32xf32, #tpu.memory_space<vmem>>, vector<8x4xf32>
    tpu.vector_store %arg13[%c0_51, %c8_52], %101 {strides = array<i32>} : memref<8x32xf32, #tpu.memory_space<vmem>>, vector<8x4xf32>,
    %103 = vector.extract_strided_slice %21 {offsets = [0, 12], sizes = [8, 4], strides = [1, 1]} : vector<8x32xbf16> to vector<8x4xbf16>
    %104 = vector.extract_strided_slice %16 {offsets = [0, 12], sizes = [8, 4], strides = [1, 1]} : vector<8x32xbf16> to vector<8x4xbf16>
    %105 = vector.extract_strided_slice %20 {offsets = [0, 12], sizes = [8, 4], strides = [1, 1]} : vector<8x32xbf16> to vector<8x4xbf16>
    %cst_53 = arith.constant dense<0.000000e+00> : vector<8x8xf32>
    %106 = tpu.matmul %103, %104, %cst_53 {dimension_numbers = #tpu.dot_dimension_numbers<[1], [1], [0], [0], [0, 0, 1, 0], [], []>} : vector<8x4xbf16>, vector<8x4xbf16>, vector<8x8xf32> -> vector<8x8xf32>
    %c0_54 = arith.constant 0 : index
    %c3 = arith.constant 3 : index
    %107 = vector.load %arg11[%c0_54, %c3] : memref<8x8xf32, #tpu.memory_space<vmem>>, vector<8x1xf32>
    %c0_55 = arith.constant 0 : index
    %c3_56 = arith.constant 3 : index
    %108 = vector.load %arg12[%c0_55, %c3_56] : memref<8x8xf32, #tpu.memory_space<vmem>>, vector<8x1xf32>
    %cst_57 = arith.constant dense<0xFF800000> : vector<8xf32>
    %109 = vector.multi_reduction <maximumf>, %106, %cst_57 [1] : vector<8x8xf32> to vector<8xf32>
    %110 = vector.shape_cast %109 : vector<8xf32> to vector<8x1xf32>
    %111 = arith.maximumf %107, %110 : vector<8x1xf32>
    %112 = arith.subf %107, %111 : vector<8x1xf32>
    %113 = math.exp %112 : vector<8x1xf32>
    %114 = vector.broadcast %111 : vector<8x1xf32> to vector<8x8xf32>
    %115 = arith.subf %106, %114 : vector<8x8xf32>
    %116 = math.exp %115 : vector<8x8xf32>
    %117 = arith.mulf %113, %108 : vector<8x1xf32>
    %cst_58 = arith.constant dense<0.000000e+00> : vector<8xf32>
    %118 = vector.multi_reduction <add>, %116, %cst_58 [1] : vector<8x8xf32> to vector<8xf32>
    %119 = vector.shape_cast %118 : vector<8xf32> to vector<8x1xf32>
    %120 = arith.addf %117, %119 : vector<8x1xf32>
    %c0_59 = arith.constant 0 : index
    %c3_60 = arith.constant 3 : index
    %121 = vector.load %arg12[%c0_59, %c3_60] : memref<8x8xf32, #tpu.memory_space<vmem>>, vector<8x1xf32>
    tpu.vector_store %arg12[%c0_59, %c3_60], %120 {strides = array<i32>} : memref<8x8xf32, #tpu.memory_space<vmem>>, vector<8x1xf32>,
    %c0_61 = arith.constant 0 : index
    %c3_62 = arith.constant 3 : index
    %122 = vector.load %arg11[%c0_61, %c3_62] : memref<8x8xf32, #tpu.memory_space<vmem>>, vector<8x1xf32>
    tpu.vector_store %arg11[%c0_61, %c3_62], %111 {strides = array<i32>} : memref<8x8xf32, #tpu.memory_space<vmem>>, vector<8x1xf32>,
    %c0_63 = arith.constant 0 : index
    %c12 = arith.constant 12 : index
    %123 = vector.load %arg13[%c0_63, %c12] : memref<8x32xf32, #tpu.memory_space<vmem>>, vector<8x4xf32>
    %124 = vector.broadcast %113 : vector<8x1xf32> to vector<8x4xf32>
    %125 = arith.mulf %124, %123 : vector<8x4xf32>
    %126 = arith.truncf %116 : vector<8x8xf32> to vector<8x8xbf16>
    %cst_64 = arith.constant dense<0.000000e+00> : vector<8x4xf32>
    %127 = tpu.matmul %126, %105, %cst_64 {dimension_numbers = #tpu.dot_dimension_numbers<[1], [0], [0], [1], [0, 0, 1, 1], [], []>} : vector<8x8xbf16>, vector<8x4xbf16>, vector<8x4xf32> -> vector<8x4xf32>
    %128 = arith.addf %125, %127 : vector<8x4xf32>
    %c0_65 = arith.constant 0 : index
    %c12_66 = arith.constant 12 : index
    %129 = vector.load %arg13[%c0_65, %c12_66] : memref<8x32xf32, #tpu.memory_space<vmem>>, vector<8x4xf32>
    tpu.vector_store %arg13[%c0_65, %c12_66], %128 {strides = array<i32>} : memref<8x32xf32, #tpu.memory_space<vmem>>, vector<8x4xf32>,
    %130 = vector.extract_strided_slice %21 {offsets = [0, 16], sizes = [8, 4], strides = [1, 1]} : vector<8x32xbf16> to vector<8x4xbf16>
    %131 = vector.extract_strided_slice %16 {offsets = [0, 16], sizes = [8, 4], strides = [1, 1]} : vector<8x32xbf16> to vector<8x4xbf16>
    %132 = vector.extract_strided_slice %20 {offsets = [0, 16], sizes = [8, 4], strides = [1, 1]} : vector<8x32xbf16> to vector<8x4xbf16>
    %cst_67 = arith.constant dense<0.000000e+00> : vector<8x8xf32>
    %133 = tpu.matmul %130, %131, %cst_67 {dimension_numbers = #tpu.dot_dimension_numbers<[1], [1], [0], [0], [0, 0, 1, 0], [], []>} : vector<8x4xbf16>, vector<8x4xbf16>, vector<8x8xf32> -> vector<8x8xf32>
    %c0_68 = arith.constant 0 : index
    %c4_69 = arith.constant 4 : index
    %134 = vector.load %arg11[%c0_68, %c4_69] : memref<8x8xf32, #tpu.memory_space<vmem>>, vector<8x1xf32>
    %c0_70 = arith.constant 0 : index
    %c4_71 = arith.constant 4 : index
    %135 = vector.load %arg12[%c0_70, %c4_71] : memref<8x8xf32, #tpu.memory_space<vmem>>, vector<8x1xf32>
    %cst_72 = arith.constant dense<0xFF800000> : vector<8xf32>
    %136 = vector.multi_reduction <maximumf>, %133, %cst_72 [1] : vector<8x8xf32> to vector<8xf32>
    %137 = vector.shape_cast %136 : vector<8xf32> to vector<8x1xf32>
    %138 = arith.maximumf %134, %137 : vector<8x1xf32>
    %139 = arith.subf %134, %138 : vector<8x1xf32>
    %140 = math.exp %139 : vector<8x1xf32>
    %141 = vector.broadcast %138 : vector<8x1xf32> to vector<8x8xf32>
    %142 = arith.subf %133, %141 : vector<8x8xf32>
    %143 = math.exp %142 : vector<8x8xf32>
    %144 = arith.mulf %140, %135 : vector<8x1xf32>
    %cst_73 = arith.constant dense<0.000000e+00> : vector<8xf32>
    %145 = vector.multi_reduction <add>, %143, %cst_73 [1] : vector<8x8xf32> to vector<8xf32>
    %146 = vector.shape_cast %145 : vector<8xf32> to vector<8x1xf32>
    %147 = arith.addf %144, %146 : vector<8x1xf32>
    %c0_74 = arith.constant 0 : index
    %c4_75 = arith.constant 4 : index
    %148 = vector.load %arg12[%c0_74, %c4_75] : memref<8x8xf32, #tpu.memory_space<vmem>>, vector<8x1xf32>
    tpu.vector_store %arg12[%c0_74, %c4_75], %147 {strides = array<i32>} : memref<8x8xf32, #tpu.memory_space<vmem>>, vector<8x1xf32>,
    %c0_76 = arith.constant 0 : index
    %c4_77 = arith.constant 4 : index
    %149 = vector.load %arg11[%c0_76, %c4_77] : memref<8x8xf32, #tpu.memory_space<vmem>>, vector<8x1xf32>
    tpu.vector_store %arg11[%c0_76, %c4_77], %138 {strides = array<i32>} : memref<8x8xf32, #tpu.memory_space<vmem>>, vector<8x1xf32>,
    %c0_78 = arith.constant 0 : index
    %c16 = arith.constant 16 : index
    %150 = vector.load %arg13[%c0_78, %c16] : memref<8x32xf32, #tpu.memory_space<vmem>>, vector<8x4xf32>
    %151 = vector.broadcast %140 : vector<8x1xf32> to vector<8x4xf32>
    %152 = arith.mulf %151, %150 : vector<8x4xf32>
    %153 = arith.truncf %143 : vector<8x8xf32> to vector<8x8xbf16>
    %cst_79 = arith.constant dense<0.000000e+00> : vector<8x4xf32>
    %154 = tpu.matmul %153, %132, %cst_79 {dimension_numbers = #tpu.dot_dimension_numbers<[1], [0], [0], [1], [0, 0, 1, 1], [], []>} : vector<8x8xbf16>, vector<8x4xbf16>, vector<8x4xf32> -> vector<8x4xf32>
    %155 = arith.addf %152, %154 : vector<8x4xf32>
    %c0_80 = arith.constant 0 : index
    %c16_81 = arith.constant 16 : index
    %156 = vector.load %arg13[%c0_80, %c16_81] : memref<8x32xf32, #tpu.memory_space<vmem>>, vector<8x4xf32>
    tpu.vector_store %arg13[%c0_80, %c16_81], %155 {strides = array<i32>} : memref<8x32xf32, #tpu.memory_space<vmem>>, vector<8x4xf32>,
    %157 = vector.extract_strided_slice %21 {offsets = [0, 20], sizes = [8, 4], strides = [1, 1]} : vector<8x32xbf16> to vector<8x4xbf16>
    %158 = vector.extract_strided_slice %16 {offsets = [0, 20], sizes = [8, 4], strides = [1, 1]} : vector<8x32xbf16> to vector<8x4xbf16>
    %159 = vector.extract_strided_slice %20 {offsets = [0, 20], sizes = [8, 4], strides = [1, 1]} : vector<8x32xbf16> to vector<8x4xbf16>
    %cst_82 = arith.constant dense<0.000000e+00> : vector<8x8xf32>
    %160 = tpu.matmul %157, %158, %cst_82 {dimension_numbers = #tpu.dot_dimension_numbers<[1], [1], [0], [0], [0, 0, 1, 0], [], []>} : vector<8x4xbf16>, vector<8x4xbf16>, vector<8x8xf32> -> vector<8x8xf32>
    %c0_83 = arith.constant 0 : index
    %c5 = arith.constant 5 : index
    %161 = vector.load %arg11[%c0_83, %c5] : memref<8x8xf32, #tpu.memory_space<vmem>>, vector<8x1xf32>
    %c0_84 = arith.constant 0 : index
    %c5_85 = arith.constant 5 : index
    %162 = vector.load %arg12[%c0_84, %c5_85] : memref<8x8xf32, #tpu.memory_space<vmem>>, vector<8x1xf32>
    %cst_86 = arith.constant dense<0xFF800000> : vector<8xf32>
    %163 = vector.multi_reduction <maximumf>, %160, %cst_86 [1] : vector<8x8xf32> to vector<8xf32>
    %164 = vector.shape_cast %163 : vector<8xf32> to vector<8x1xf32>
    %165 = arith.maximumf %161, %164 : vector<8x1xf32>
    %166 = arith.subf %161, %165 : vector<8x1xf32>
    %167 = math.exp %166 : vector<8x1xf32>
    %168 = vector.broadcast %165 : vector<8x1xf32> to vector<8x8xf32>
    %169 = arith.subf %160, %168 : vector<8x8xf32>
    %170 = math.exp %169 : vector<8x8xf32>
    %171 = arith.mulf %167, %162 : vector<8x1xf32>
    %cst_87 = arith.constant dense<0.000000e+00> : vector<8xf32>
    %172 = vector.multi_reduction <add>, %170, %cst_87 [1] : vector<8x8xf32> to vector<8xf32>
    %173 = vector.shape_cast %172 : vector<8xf32> to vector<8x1xf32>
    %174 = arith.addf %171, %173 : vector<8x1xf32>
    %c0_88 = arith.constant 0 : index
    %c5_89 = arith.constant 5 : index
    %175 = vector.load %arg12[%c0_88, %c5_89] : memref<8x8xf32, #tpu.memory_space<vmem>>, vector<8x1xf32>
    tpu.vector_store %arg12[%c0_88, %c5_89], %174 {strides = array<i32>} : memref<8x8xf32, #tpu.memory_space<vmem>>, vector<8x1xf32>,
    %c0_90 = arith.constant 0 : index
    %c5_91 = arith.constant 5 : index
    %176 = vector.load %arg11[%c0_90, %c5_91] : memref<8x8xf32, #tpu.memory_space<vmem>>, vector<8x1xf32>
    tpu.vector_store %arg11[%c0_90, %c5_91], %165 {strides = array<i32>} : memref<8x8xf32, #tpu.memory_space<vmem>>, vector<8x1xf32>,
    %c0_92 = arith.constant 0 : index
    %c20 = arith.constant 20 : index
    %177 = vector.load %arg13[%c0_92, %c20] : memref<8x32xf32, #tpu.memory_space<vmem>>, vector<8x4xf32>
    %178 = vector.broadcast %167 : vector<8x1xf32> to vector<8x4xf32>
    %179 = arith.mulf %178, %177 : vector<8x4xf32>
    %180 = arith.truncf %170 : vector<8x8xf32> to vector<8x8xbf16>
    %cst_93 = arith.constant dense<0.000000e+00> : vector<8x4xf32>
    %181 = tpu.matmul %180, %159, %cst_93 {dimension_numbers = #tpu.dot_dimension_numbers<[1], [0], [0], [1], [0, 0, 1, 1], [], []>} : vector<8x8xbf16>, vector<8x4xbf16>, vector<8x4xf32> -> vector<8x4xf32>
    %182 = arith.addf %179, %181 : vector<8x4xf32>
    %c0_94 = arith.constant 0 : index
    %c20_95 = arith.constant 20 : index
    %183 = vector.load %arg13[%c0_94, %c20_95] : memref<8x32xf32, #tpu.memory_space<vmem>>, vector<8x4xf32>
    tpu.vector_store %arg13[%c0_94, %c20_95], %182 {strides = array<i32>} : memref<8x32xf32, #tpu.memory_space<vmem>>, vector<8x4xf32>,
    %184 = vector.extract_strided_slice %21 {offsets = [0, 24], sizes = [8, 4], strides = [1, 1]} : vector<8x32xbf16> to vector<8x4xbf16>
    %185 = vector.extract_strided_slice %16 {offsets = [0, 24], sizes = [8, 4], strides = [1, 1]} : vector<8x32xbf16> to vector<8x4xbf16>
    %186 = vector.extract_strided_slice %20 {offsets = [0, 24], sizes = [8, 4], strides = [1, 1]} : vector<8x32xbf16> to vector<8x4xbf16>
    %cst_96 = arith.constant dense<0.000000e+00> : vector<8x8xf32>
    %187 = tpu.matmul %184, %185, %cst_96 {dimension_numbers = #tpu.dot_dimension_numbers<[1], [1], [0], [0], [0, 0, 1, 0], [], []>} : vector<8x4xbf16>, vector<8x4xbf16>, vector<8x8xf32> -> vector<8x8xf32>
    %c0_97 = arith.constant 0 : index
    %c6 = arith.constant 6 : index
    %188 = vector.load %arg11[%c0_97, %c6] : memref<8x8xf32, #tpu.memory_space<vmem>>, vector<8x1xf32>
    %c0_98 = arith.constant 0 : index
    %c6_99 = arith.constant 6 : index
    %189 = vector.load %arg12[%c0_98, %c6_99] : memref<8x8xf32, #tpu.memory_space<vmem>>, vector<8x1xf32>
    %cst_100 = arith.constant dense<0xFF800000> : vector<8xf32>
    %190 = vector.multi_reduction <maximumf>, %187, %cst_100 [1] : vector<8x8xf32> to vector<8xf32>
    %191 = vector.shape_cast %190 : vector<8xf32> to vector<8x1xf32>
    %192 = arith.maximumf %188, %191 : vector<8x1xf32>
    %193 = arith.subf %188, %192 : vector<8x1xf32>
    %194 = math.exp %193 : vector<8x1xf32>
    %195 = vector.broadcast %192 : vector<8x1xf32> to vector<8x8xf32>
    %196 = arith.subf %187, %195 : vector<8x8xf32>
    %197 = math.exp %196 : vector<8x8xf32>
    %198 = arith.mulf %194, %189 : vector<8x1xf32>
    %cst_101 = arith.constant dense<0.000000e+00> : vector<8xf32>
    %199 = vector.multi_reduction <add>, %197, %cst_101 [1] : vector<8x8xf32> to vector<8xf32>
    %200 = vector.shape_cast %199 : vector<8xf32> to vector<8x1xf32>
    %201 = arith.addf %198, %200 : vector<8x1xf32>
    %c0_102 = arith.constant 0 : index
    %c6_103 = arith.constant 6 : index
    %202 = vector.load %arg12[%c0_102, %c6_103] : memref<8x8xf32, #tpu.memory_space<vmem>>, vector<8x1xf32>
    tpu.vector_store %arg12[%c0_102, %c6_103], %201 {strides = array<i32>} : memref<8x8xf32, #tpu.memory_space<vmem>>, vector<8x1xf32>,
    %c0_104 = arith.constant 0 : index
    %c6_105 = arith.constant 6 : index
    %203 = vector.load %arg11[%c0_104, %c6_105] : memref<8x8xf32, #tpu.memory_space<vmem>>, vector<8x1xf32>
    tpu.vector_store %arg11[%c0_104, %c6_105], %192 {strides = array<i32>} : memref<8x8xf32, #tpu.memory_space<vmem>>, vector<8x1xf32>,
    %c0_106 = arith.constant 0 : index
    %c24 = arith.constant 24 : index
    %204 = vector.load %arg13[%c0_106, %c24] : memref<8x32xf32, #tpu.memory_space<vmem>>, vector<8x4xf32>
    %205 = vector.broadcast %194 : vector<8x1xf32> to vector<8x4xf32>
    %206 = arith.mulf %205, %204 : vector<8x4xf32>
    %207 = arith.truncf %197 : vector<8x8xf32> to vector<8x8xbf16>
    %cst_107 = arith.constant dense<0.000000e+00> : vector<8x4xf32>
    %208 = tpu.matmul %207, %186, %cst_107 {dimension_numbers = #tpu.dot_dimension_numbers<[1], [0], [0], [1], [0, 0, 1, 1], [], []>} : vector<8x8xbf16>, vector<8x4xbf16>, vector<8x4xf32> -> vector<8x4xf32>
    %209 = arith.addf %206, %208 : vector<8x4xf32>
    %c0_108 = arith.constant 0 : index
    %c24_109 = arith.constant 24 : index
    %210 = vector.load %arg13[%c0_108, %c24_109] : memref<8x32xf32, #tpu.memory_space<vmem>>, vector<8x4xf32>
    tpu.vector_store %arg13[%c0_108, %c24_109], %209 {strides = array<i32>} : memref<8x32xf32, #tpu.memory_space<vmem>>, vector<8x4xf32>,
    %211 = vector.extract_strided_slice %21 {offsets = [0, 28], sizes = [8, 4], strides = [1, 1]} : vector<8x32xbf16> to vector<8x4xbf16>
    %212 = vector.extract_strided_slice %16 {offsets = [0, 28], sizes = [8, 4], strides = [1, 1]} : vector<8x32xbf16> to vector<8x4xbf16>
    %213 = vector.extract_strided_slice %20 {offsets = [0, 28], sizes = [8, 4], strides = [1, 1]} : vector<8x32xbf16> to vector<8x4xbf16>
    %cst_110 = arith.constant dense<0.000000e+00> : vector<8x8xf32>
    %214 = tpu.matmul %211, %212, %cst_110 {dimension_numbers = #tpu.dot_dimension_numbers<[1], [1], [0], [0], [0, 0, 1, 0], [], []>} : vector<8x4xbf16>, vector<8x4xbf16>, vector<8x8xf32> -> vector<8x8xf32>
    %c0_111 = arith.constant 0 : index
    %c7 = arith.constant 7 : index
    %215 = vector.load %arg11[%c0_111, %c7] : memref<8x8xf32, #tpu.memory_space<vmem>>, vector<8x1xf32>
    %c0_112 = arith.constant 0 : index
    %c7_113 = arith.constant 7 : index
    %216 = vector.load %arg12[%c0_112, %c7_113] : memref<8x8xf32, #tpu.memory_space<vmem>>, vector<8x1xf32>
    %cst_114 = arith.constant dense<0xFF800000> : vector<8xf32>
    %217 = vector.multi_reduction <maximumf>, %214, %cst_114 [1] : vector<8x8xf32> to vector<8xf32>
    %218 = vector.shape_cast %217 : vector<8xf32> to vector<8x1xf32>
    %219 = arith.maximumf %215, %218 : vector<8x1xf32>
    %220 = arith.subf %215, %219 : vector<8x1xf32>
    %221 = math.exp %220 : vector<8x1xf32>
    %222 = vector.broadcast %219 : vector<8x1xf32> to vector<8x8xf32>
    %223 = arith.subf %214, %222 : vector<8x8xf32>
    %224 = math.exp %223 : vector<8x8xf32>
    %225 = arith.mulf %221, %216 : vector<8x1xf32>
    %cst_115 = arith.constant dense<0.000000e+00> : vector<8xf32>
    %226 = vector.multi_reduction <add>, %224, %cst_115 [1] : vector<8x8xf32> to vector<8xf32>
    %227 = vector.shape_cast %226 : vector<8xf32> to vector<8x1xf32>
    %228 = arith.addf %225, %227 : vector<8x1xf32>
    %c0_116 = arith.constant 0 : index
    %c7_117 = arith.constant 7 : index
    %229 = vector.load %arg12[%c0_116, %c7_117] : memref<8x8xf32, #tpu.memory_space<vmem>>, vector<8x1xf32>
    tpu.vector_store %arg12[%c0_116, %c7_117], %228 {strides = array<i32>} : memref<8x8xf32, #tpu.memory_space<vmem>>, vector<8x1xf32>,
    %c0_118 = arith.constant 0 : index
    %c7_119 = arith.constant 7 : index
    %230 = vector.load %arg11[%c0_118, %c7_119] : memref<8x8xf32, #tpu.memory_space<vmem>>, vector<8x1xf32>
    tpu.vector_store %arg11[%c0_118, %c7_119], %219 {strides = array<i32>} : memref<8x8xf32, #tpu.memory_space<vmem>>, vector<8x1xf32>,
    %c0_120 = arith.constant 0 : index
    %c28 = arith.constant 28 : index
    %231 = vector.load %arg13[%c0_120, %c28] : memref<8x32xf32, #tpu.memory_space<vmem>>, vector<8x4xf32>
    %232 = vector.broadcast %221 : vector<8x1xf32> to vector<8x4xf32>
    %233 = arith.mulf %232, %231 : vector<8x4xf32>
    %234 = arith.truncf %224 : vector<8x8xf32> to vector<8x8xbf16>
    %cst_121 = arith.constant dense<0.000000e+00> : vector<8x4xf32>
    %235 = tpu.matmul %234, %213, %cst_121 {dimension_numbers = #tpu.dot_dimension_numbers<[1], [0], [0], [1], [0, 0, 1, 1], [], []>} : vector<8x8xbf16>, vector<8x4xbf16>, vector<8x4xf32> -> vector<8x4xf32>
    %236 = arith.addf %233, %235 : vector<8x4xf32>
    %c0_122 = arith.constant 0 : index
    %c28_123 = arith.constant 28 : index
    %237 = vector.load %arg13[%c0_122, %c28_123] : memref<8x32xf32, #tpu.memory_space<vmem>>, vector<8x4xf32>
    tpu.vector_store %arg13[%c0_122, %c28_123], %236 {strides = array<i32>} : memref<8x32xf32, #tpu.memory_space<vmem>>, vector<8x4xf32>,
    %c0_i32_124 = arith.constant 0 : i32
    %238 = arith.cmpi eq, %arg2, %c0_i32_124 : i32
    %239 = arith.extui %238 : i1 to i32
    %c0_i32_125 = arith.constant 0 : i32
    %240 = arith.cmpi ne, %239, %c0_i32_125 : i32
    scf.if %240 {
      %c0_126 = arith.constant 0 : index
      %c0_127 = arith.constant 0 : index
      %241 = vector.load %arg12[%c0_126, %c0_127] : memref<8x8xf32, #tpu.memory_space<vmem>>, vector<8x1xf32>
      %242 = tpu.reciprocal %241 {approx = true} : vector<8x1xf32> -> vector<8x1xf32>
      %c0_128 = arith.constant 0 : index
      %c0_129 = arith.constant 0 : index
      %243 = vector.load %arg13[%c0_128, %c0_129] : memref<8x32xf32, #tpu.memory_space<vmem>>, vector<8x4xf32>
      %244 = vector.broadcast %242 : vector<8x1xf32> to vector<8x4xf32>
      %245 = arith.mulf %243, %244 : vector<8x4xf32>
      %c0_130 = arith.constant 0 : index
      %c0_131 = arith.constant 0 : index
      %246 = vector.load %arg13[%c0_130, %c0_131] : memref<8x32xf32, #tpu.memory_space<vmem>>, vector<8x4xf32>
      tpu.vector_store %arg13[%c0_130, %c0_131], %245 {strides = array<i32>} : memref<8x32xf32, #tpu.memory_space<vmem>>, vector<8x4xf32>,
      %c0_132 = arith.constant 0 : index
      %c1_133 = arith.constant 1 : index
      %247 = vector.load %arg12[%c0_132, %c1_133] : memref<8x8xf32, #tpu.memory_space<vmem>>, vector<8x1xf32>
      %248 = tpu.reciprocal %247 {approx = true} : vector<8x1xf32> -> vector<8x1xf32>
      %c0_134 = arith.constant 0 : index
      %c4_135 = arith.constant 4 : index
      %249 = vector.load %arg13[%c0_134, %c4_135] : memref<8x32xf32, #tpu.memory_space<vmem>>, vector<8x4xf32>
      %250 = vector.broadcast %248 : vector<8x1xf32> to vector<8x4xf32>
      %251 = arith.mulf %249, %250 : vector<8x4xf32>
      %c0_136 = arith.constant 0 : index
      %c4_137 = arith.constant 4 : index
      %252 = vector.load %arg13[%c0_136, %c4_137] : memref<8x32xf32, #tpu.memory_space<vmem>>, vector<8x4xf32>
      tpu.vector_store %arg13[%c0_136, %c4_137], %251 {strides = array<i32>} : memref<8x32xf32, #tpu.memory_space<vmem>>, vector<8x4xf32>,
      %c0_138 = arith.constant 0 : index
      %c2_139 = arith.constant 2 : index
      %253 = vector.load %arg12[%c0_138, %c2_139] : memref<8x8xf32, #tpu.memory_space<vmem>>, vector<8x1xf32>
      %254 = tpu.reciprocal %253 {approx = true} : vector<8x1xf32> -> vector<8x1xf32>
      %c0_140 = arith.constant 0 : index
      %c8_141 = arith.constant 8 : index
      %255 = vector.load %arg13[%c0_140, %c8_141] : memref<8x32xf32, #tpu.memory_space<vmem>>, vector<8x4xf32>
      %256 = vector.broadcast %254 : vector<8x1xf32> to vector<8x4xf32>
      %257 = arith.mulf %255, %256 : vector<8x4xf32>
      %c0_142 = arith.constant 0 : index
      %c8_143 = arith.constant 8 : index
      %258 = vector.load %arg13[%c0_142, %c8_143] : memref<8x32xf32, #tpu.memory_space<vmem>>, vector<8x4xf32>
      tpu.vector_store %arg13[%c0_142, %c8_143], %257 {strides = array<i32>} : memref<8x32xf32, #tpu.memory_space<vmem>>, vector<8x4xf32>,
      %c0_144 = arith.constant 0 : index
      %c3_145 = arith.constant 3 : index
      %259 = vector.load %arg12[%c0_144, %c3_145] : memref<8x8xf32, #tpu.memory_space<vmem>>, vector<8x1xf32>
      %260 = tpu.reciprocal %259 {approx = true} : vector<8x1xf32> -> vector<8x1xf32>
      %c0_146 = arith.constant 0 : index
      %c12_147 = arith.constant 12 : index
      %261 = vector.load %arg13[%c0_146, %c12_147] : memref<8x32xf32, #tpu.memory_space<vmem>>, vector<8x4xf32>
      %262 = vector.broadcast %260 : vector<8x1xf32> to vector<8x4xf32>
      %263 = arith.mulf %261, %262 : vector<8x4xf32>
      %c0_148 = arith.constant 0 : index
      %c12_149 = arith.constant 12 : index
      %264 = vector.load %arg13[%c0_148, %c12_149] : memref<8x32xf32, #tpu.memory_space<vmem>>, vector<8x4xf32>
      tpu.vector_store %arg13[%c0_148, %c12_149], %263 {strides = array<i32>} : memref<8x32xf32, #tpu.memory_space<vmem>>, vector<8x4xf32>,
      %c0_150 = arith.constant 0 : index
      %c4_151 = arith.constant 4 : index
      %265 = vector.load %arg12[%c0_150, %c4_151] : memref<8x8xf32, #tpu.memory_space<vmem>>, vector<8x1xf32>
      %266 = tpu.reciprocal %265 {approx = true} : vector<8x1xf32> -> vector<8x1xf32>
      %c0_152 = arith.constant 0 : index
      %c16_153 = arith.constant 16 : index
      %267 = vector.load %arg13[%c0_152, %c16_153] : memref<8x32xf32, #tpu.memory_space<vmem>>, vector<8x4xf32>
      %268 = vector.broadcast %266 : vector<8x1xf32> to vector<8x4xf32>
      %269 = arith.mulf %267, %268 : vector<8x4xf32>
      %c0_154 = arith.constant 0 : index
      %c16_155 = arith.constant 16 : index
      %270 = vector.load %arg13[%c0_154, %c16_155] : memref<8x32xf32, #tpu.memory_space<vmem>>, vector<8x4xf32>
      tpu.vector_store %arg13[%c0_154, %c16_155], %269 {strides = array<i32>} : memref<8x32xf32, #tpu.memory_space<vmem>>, vector<8x4xf32>,
      %c0_156 = arith.constant 0 : index
      %c5_157 = arith.constant 5 : index
      %271 = vector.load %arg12[%c0_156, %c5_157] : memref<8x8xf32, #tpu.memory_space<vmem>>, vector<8x1xf32>
      %272 = tpu.reciprocal %271 {approx = true} : vector<8x1xf32> -> vector<8x1xf32>
      %c0_158 = arith.constant 0 : index
      %c20_159 = arith.constant 20 : index
      %273 = vector.load %arg13[%c0_158, %c20_159] : memref<8x32xf32, #tpu.memory_space<vmem>>, vector<8x4xf32>
      %274 = vector.broadcast %272 : vector<8x1xf32> to vector<8x4xf32>
      %275 = arith.mulf %273, %274 : vector<8x4xf32>
      %c0_160 = arith.constant 0 : index
      %c20_161 = arith.constant 20 : index
      %276 = vector.load %arg13[%c0_160, %c20_161] : memref<8x32xf32, #tpu.memory_space<vmem>>, vector<8x4xf32>
      tpu.vector_store %arg13[%c0_160, %c20_161], %275 {strides = array<i32>} : memref<8x32xf32, #tpu.memory_space<vmem>>, vector<8x4xf32>,
      %c0_162 = arith.constant 0 : index
      %c6_163 = arith.constant 6 : index
      %277 = vector.load %arg12[%c0_162, %c6_163] : memref<8x8xf32, #tpu.memory_space<vmem>>, vector<8x1xf32>
      %278 = tpu.reciprocal %277 {approx = true} : vector<8x1xf32> -> vector<8x1xf32>
      %c0_164 = arith.constant 0 : index
      %c24_165 = arith.constant 24 : index
      %279 = vector.load %arg13[%c0_164, %c24_165] : memref<8x32xf32, #tpu.memory_space<vmem>>, vector<8x4xf32>
      %280 = vector.broadcast %278 : vector<8x1xf32> to vector<8x4xf32>
      %281 = arith.mulf %279, %280 : vector<8x4xf32>
      %c0_166 = arith.constant 0 : index
      %c24_167 = arith.constant 24 : index
      %282 = vector.load %arg13[%c0_166, %c24_167] : memref<8x32xf32, #tpu.memory_space<vmem>>, vector<8x4xf32>
      tpu.vector_store %arg13[%c0_166, %c24_167], %281 {strides = array<i32>} : memref<8x32xf32, #tpu.memory_space<vmem>>, vector<8x4xf32>,
      %c0_168 = arith.constant 0 : index
      %c7_169 = arith.constant 7 : index
      %283 = vector.load %arg12[%c0_168, %c7_169] : memref<8x8xf32, #tpu.memory_space<vmem>>, vector<8x1xf32>
      %284 = tpu.reciprocal %283 {approx = true} : vector<8x1xf32> -> vector<8x1xf32>
      %c0_170 = arith.constant 0 : index
      %c28_171 = arith.constant 28 : index
      %285 = vector.load %arg13[%c0_170, %c28_171] : memref<8x32xf32, #tpu.memory_space<vmem>>, vector<8x4xf32>
      %286 = vector.broadcast %284 : vector<8x1xf32> to vector<8x4xf32>
      %287 = arith.mulf %285, %286 : vector<8x4xf32>
      %c0_172 = arith.constant 0 : index
      %c28_173 = arith.constant 28 : index
      %288 = vector.load %arg13[%c0_172, %c28_173] : memref<8x32xf32, #tpu.memory_space<vmem>>, vector<8x4xf32>
      tpu.vector_store %arg13[%c0_172, %c28_173], %287 {strides = array<i32>} : memref<8x32xf32, #tpu.memory_space<vmem>>, vector<8x4xf32>,
      %c0_174 = arith.constant 0 : index
      %c0_175 = arith.constant 0 : index
      %289 = vector.load %arg13[%c0_174, %c0_175] : memref<8x32xf32, #tpu.memory_space<vmem>>, vector<8x32xf32>
      %290 = arith.truncf %289 : vector<8x32xf32> to vector<8x32xbf16>
      %c0_176 = arith.constant 0 : index
      %c0_177 = arith.constant 0 : index
      %291 = vector.load %arg8[%c0_176, %c0_177] : memref<32x32xbf16, #tpu.memory_space<vmem>>, vector<32x32xbf16>
      %cst_178 = arith.constant dense<0.000000e+00> : vector<8x32xf32>
      %292 = tpu.matmul %290, %291, %cst_178 {dimension_numbers = #tpu.dot_dimension_numbers<[1], [0], [0], [1], [0, 0, 1, 1], [], []>} : vector<8x32xbf16>, vector<32x32xbf16>, vector<8x32xf32> -> vector<8x32xf32>
      %293 = vector.broadcast %4 : vector<1x32xf32> to vector<8x32xf32>
      %294 = arith.addf %292, %293 : vector<8x32xf32>
      %c0_179 = arith.constant 0 : index
      %c0_180 = arith.constant 0 : index
      %c0_181 = arith.constant 0 : index
      %295 = vector.load %arg9[%c0_179, %c0_180, %c0_181] : memref<1x8x32xf32, #tpu.memory_space<vmem>>, vector<1x8x32xf32>
      %296 = vector.shape_cast %295 : vector<1x8x32xf32> to vector<8x32xf32>
      %297 = vector.shape_cast %294 : vector<8x32xf32> to vector<1x8x32xf32>
      tpu.vector_store %arg9[%c0_179, %c0_180, %c0_181], %297 {strides = array<i32>} : memref<1x8x32xf32, #tpu.memory_space<vmem>>, vector<1x8x32xf32>,
    } else {
    }
    return
  }
  func.func @transform_0(%arg0: i32, %arg1: i32, %arg2: i32) -> (i32, i32, i32) {
    %c0_i32 = arith.constant 0 : i32
    %c0_i32_0 = arith.constant 0 : i32
    return %arg0, %arg1, %c0_i32 : i32, i32, i32
  }
  func.func @transform_1(%arg0: i32, %arg1: i32, %arg2: i32) -> (i32, i32, i32) {
    %c0_i32 = arith.constant 0 : i32
    %c0_i32_0 = arith.constant 0 : i32
    return %arg0, %arg2, %c0_i32 : i32, i32, i32
  }
  func.func @transform_2(%arg0: i32, %arg1: i32, %arg2: i32) -> (i32, i32) {
    %c0_i32 = arith.constant 0 : i32
    %c0_i32_0 = arith.constant 0 : i32
    %c0_i32_1 = arith.constant 0 : i32
    return %c0_i32, %c0_i32_0 : i32, i32
  }
  func.func @transform_3(%arg0: i32, %arg1: i32, %arg2: i32) -> (i32, i32) {
    %c0_i32 = arith.constant 0 : i32
    %c0_i32_0 = arith.constant 0 : i32
    %c0_i32_1 = arith.constant 0 : i32
    return %c0_i32, %c0_i32_0 : i32, i32
  }
  func.func @transform_4(%arg0: i32, %arg1: i32, %arg2: i32) -> (i32, i32) {
    %c0_i32 = arith.constant 0 : i32
    %c0_i32_0 = arith.constant 0 : i32
    %c0_i32_1 = arith.constant 0 : i32
    return %c0_i32, %c0_i32_0 : i32, i32
  }
  func.func @transform_5(%arg0: i32, %arg1: i32, %arg2: i32) -> (i32, i32) {
    %c0_i32 = arith.constant 0 : i32
    %c0_i32_0 = arith.constant 0 : i32
    %c0_i32_1 = arith.constant 0 : i32
    return %c0_i32, %c0_i32_0 : i32, i32
  }
  func.func @transform_6(%arg0: i32, %arg1: i32, %arg2: i32) -> (i32, i32, i32) {
    %c0_i32 = arith.constant 0 : i32
    %c0_i32_0 = arith.constant 0 : i32
    return %arg0, %arg1, %c0_i32 : i32, i32, i32
  }
}

</mosaic_0001>

<bundles_post_ra>
// kernel: tpu_custom_call.1
= control target key start
LH: loop header
LB: loop body
LE: loop exit
PB: predicated region body
PF: predicated region fallthrough
CT: control target
= control target key end

     0   :  { %s3217_s0 = inlined_call_operand.hbm [shape: f32[2,8,32], index: 0, kind: input, shape index: {}]   ;;  %s3218_s1 = inlined_call_operand.hbm [shape: f32[2,8,32], index: 1, kind: input, shape index: {}]   ;;  %s3219_s2 = inlined_call_operand.hbm [shape: bf16[32,32], index: 2, kind: input, shape index: {}]   ;;  %s3220_s3 = inlined_call_operand.hbm [shape: bf16[32,64], index: 3, kind: input, shape index: {}]   ;;  %s3221_s4 = inlined_call_operand.vmem [shape: f32[4,32], index: 4, kind: input, shape index: {}]   ;;  %s3222_s5 = inlined_call_operand.hbm [shape: bf16[32,32], index: 5, kind: input, shape index: {}]   ;;  %s3223_s6 = inlined_call_operand.hbm [shape: f32[2,8,32], index: 6, kind: output, shape index: {}]  }
   0x1   :  { %3226 = sst [smem:[#allocation21_spill]] %s3217_s0 }
   0x2   :  { %3227 = sst [smem:[#allocation22_spill]] %s3219_s2 }
   0x3   :  { %3228 = sst [smem:[#allocation23_spill]] %s3220_s3 }
   0x4   :  { %3229 = sst [smem:[#allocation24_spill]] %s3222_s5 }
   0x5   :  { %11 = vsyncpa [#allocation7], 0 }
   0x6   :  { %13 = vsyncpa [#allocation7 + $0x1], 0 }
   0x7   :  { %14 = vsyncpa [#allocation10], 0 }
   0x8   :  { %16 = vsyncpa [#allocation10 + $0x1], 0 }
   0x9   :  { %17 = vsyncpa [#allocation13], 0 }
   0xa   :  { %18 = vsyncpa [#allocation8], 0 }
   0xb   :  { %20 = vsyncpa [#allocation8 + $0x1], 0  ;;  %s2649_s21 = smov 0   ;;  %s2651_s22 = smov 0  }
   0xc   :  { %s2653_s23 = smov 0   ;;  %s2655_s24 = smov 0  }
   0xd   :  { %s2657_s25 = smov 0   ;;  %s2659_s26 = smov 0  }
   0xe LB: > { %s2680_s27 = sadd.s32 4294967295, %s2570_s26   ;;  %s1936_s28 = sadd.s32 4294967294, %s2570_s26   ;;  %s2570_s26 = sphi %s2659_s26, %s26_s26   ;;  %s2566_s25 = sphi %s2657_s25, %s3252_s25   ;;  %s2562_s24 = sphi %s2655_s24, %s3251_s24   ;;  %s2558_s23 = sphi %s2653_s23, %s3250_s23   ;;  %s2554_s22 = sphi %s2651_s22, %s3249_s22   ;;  %s2550_s21 = sphi %s2649_s21, %s3248_s21  }
   0xf   : > { %p67_p0 = scmp.ne.s32.totalorder %s2554_s22, %s2550_s21  ;;  %p3224_p1 = scmp.eq.s32.totalorder %s2680_s27, 0 }
  0x10   : > { %p211_p3 = scmp.eq.s32.totalorder %s1936_s28, 1  ;;  %p1937_p5 = scmp.ge.s32.totalorder %s2570_s26, 1 }
  0x11   : > { %p2689_p4 = por %p3224_p1, %p67_p0  ;;  %p218_p7 = scmp.lt.s32.totalorder %s2570_s26, 3 }
  0x12   : > { %p2694_p6 = por %p211_p3, %p67_p0  ;;  %s2572_s8 = smov [#allocation11]  }
  0x13   : > { %s3230_s29 = scalar_select %p2689_p4, 1, 0 }
  0x14   : > { %s3231_s30 = scalar_select %p2694_p6, 1, 0 }
  0x15   : > { %p2699_p8 = pnand %p1937_p5, %p218_p7  ;;  %s230_s9 = sshll.u32 %s2572_s8, 4  ;;  %s231_s9 = int_to_ptr.vmem [resolvable:$true] %s230_s9 }
  0x16   : > { %s2573_s11 = smov [#allocation12]   ;;  %s2574_s13 = smov [#allocation14]  }
  0x17   : > { %p2162_p9 = pneg %p2699_p8  ;;  %s243_s12 = sshll.u32 %s2573_s11, 4  ;;  %s244_s12 = int_to_ptr.vmem [resolvable:$true] %s243_s12 }
  0x18   : > { %s259_s14 = sshll.u32 %s2574_s13, 4  ;;  %s2355_s15 = scalar_lea.vmem %s231_s9, 256  ;;  %s260_s14 = int_to_ptr.vmem [resolvable:$true] %s259_s14 }
  0x19   : > { %p2708_p11 = pnand %p2162_p9, %p3224_p1  ;;  %p2356_p13 = scmp.ne.s32.totalorder %s231_s9, %s2355_s15 }
  0x1a   : > { %p2363_p5 = scmp.lt.s32.totalorder %s231_s9, %s231_s9  ;;  %p2364_p7 = scmp.lt.s32.totalorder %s2355_s15, %s2355_s15 }
  0x1b   : > { %p2346_p12 = pneg %p2708_p11 }
  0x1c   : > { %p2365_p9 = por %p2364_p7, %p2363_p5 }
  0x1d   : > { %p2358_p0 = pnand %p2356_p13, %p2346_p12 }
  0x1f   : > { %p2359_p3 = pneg %p2358_p0 }
  0x21   : > { %p2366_p10 = pnand %p2365_p9, %p2359_p3 }
  0x23   : > { %2369 = shalt.err (!%p2366_p10)
}
  0x24   : > { %s2575_s16 = smov 64   ;;  %s2576_s17 = smov 4  }
  0x25   : > { %s3234_s2 = sld [smem:[#allocation22_spill]]  ;;  %s2381_s20 = scalar_lea.vmem %s244_s12, 256 }
  0x26   : > { %p2382_p1 = scmp.ne.s32.totalorder %s244_s12, %s2381_s20  ;;  %p2389_p2 = scmp.lt.s32.totalorder %s244_s12, %s244_s12 }
  0x27   : > { %p2390_p6 = scmp.lt.s32.totalorder %s2381_s20, %s2381_s20 }
  0x28   : > { %p2384_p13 = pnand %p2382_p1, %p2346_p12 }
  0x29   : > { %p2391_p5 = por %p2390_p6, %p2389_p2 }
  0x2a   : > { %p2385_p0 = pneg %p2384_p13 }
  0x2b   : > { %2165 = dma.hbm_to_vmem [thread:$0]  (!%p2708_p11), %s3234_s2, 256, %s231_s9, [#allocation10], %s2575_s16, %s2575_s16, %s2576_s17  }
  0x2c   : > { %p2392_p3 = pnand %p2391_p5, %p2385_p0 }
  0x2e   : > { %2395 = shalt.err (!%p2392_p3)
}
  0x2f   : > { %s3235_s3 = sld [smem:[#allocation23_spill]]  ;;  %s2407_s9 = scalar_lea.vmem %s260_s14, 256 }
  0x30   : > { %p2408_p10 = scmp.ne.s32.totalorder %s260_s14, %s2407_s9  ;;  %p2415_p9 = scmp.lt.s32.totalorder %s260_s14, %s260_s14 }
  0x31   : > { %p2416_p13 = scmp.lt.s32.totalorder %s2407_s9, %s2407_s9 }
  0x32   : > { %p2410_p7 = pnand %p2408_p10, %p2346_p12 }
  0x33   : > { %p2417_p4 = por %p2416_p13, %p2415_p9 }
  0x34   : > { %p2411_p1 = pneg %p2410_p7 }
  0x35   : > { %2168 = dma.hbm_to_vmem [thread:$0]  (!%p2708_p11), %s3235_s3, 256, %s244_s12, [#allocation13], %s2575_s16, %s2575_s16, %s2576_s17  }
  0x36   : > { %p2418_p2 = pnand %p2417_p4, %p2411_p1 }
  0x38   : > { %2421 = shalt.err (!%p2418_p2)
}
  0x39   : > { %s3236_s5 = sld [smem:[#allocation24_spill]]  ;;  %s54_s12 = sadd.s32 1, %s2558_s23 }
  0x3a   : > { %s45_s15 = sadd.s32 1, %s2566_s25  ;;  %p61_p4 = scmp.ne.s32.totalorder %s2558_s23, %s2554_s22 }
  0x3b   : > { %p47_p6 = scmp.ge.s32.totalorder %s45_s15, 2  ;;  %p62_p12 = scmp.eq.s32.totalorder %s2570_s26, 0 }
  0x3c   : > { %p3237_p0 = scmp.eq.s32.totalorder %s2680_s27, 1  ;;  %p2186_p3 = scmp.lt.s32.totalorder %s2570_s26, 2 }
  0x3d   : > { %s3254_s15 = smov (%p47_p6, %s45_s15), 0  ;;  %p63_p10 = por %p62_p12, %p61_p4 }
  0x3e   : > { %p2745_p5 = por %p3237_p0, %p61_p4  ;;  %s273_s18 = sand.u32 1, %s2558_s23  }
  0x3f   : > { %2171 = dma.hbm_to_vmem [thread:$0]  (!%p2708_p11), %s3236_s5, 256, %s260_s14, [#allocation13], %s2575_s16, %s2575_s16, %s2576_s17  }
  0x40   : > { %s49_s19 = ssub.s32 %s2566_s25, %s3254_s15  ;;  %s1942_s14 = sshll.u32 %s273_s18, 3 }
  0x41   : > { %p52_p11 = scmp.eq.s32.totalorder %s49_s19, 0  ;;  %s1943_s16 = sshll.u32 %s2566_s25, 7 }
  0x42   : > { %s3239_s0 = sld [smem:[#allocation21_spill]]  ;;  %s277_s9 = scalar_lea.vmem [#allocation6], %s1942_s14 }
  0x43   : > { %s2757_s17 = scalar_select %p52_p11, %s2558_s23, %s54_s12  }
  0x44   : > { %s285_s11 = sshll.u32 %s277_s9, 4  ;;  %p2764_p7 = pnand %p2186_p3, %p63_p10  ;;  %s286_s11 = int_to_ptr.vmem [resolvable:$true] %s285_s11 }
  0x45   : > { %s2771_s19 = scalar_lea.hbm %s3218_s1, %s1943_s16  ;;  %s292_s12 = sand.u32 1, %s2570_s26  }
  0x46   : > { %s274_s5 = scalar_lea.sflag [#allocation7], %s273_s18  ;;  %p2424_p1 = pneg %p2764_p7 }
  0x47   : > { %s2435_s20 = scalar_lea.vmem %s286_s11, 128  ;;  %s2577_s28 = smov [#allocation6]  }
  0x48   : > { %s283_s8 = scalar_lea.hbm %s3239_s0, %s1943_s16  ;;  %p2436_p9 = scmp.ne.s32.totalorder %s286_s11, %s2435_s20 }
  0x49   : > { %s2440_s9 = sshll.u32 %s2577_s28, 4  ;;  %s2441_s9 = int_to_ptr.vmem [resolvable:$false] %s2440_s9 }
  0x4a   : > { %p2438_p13 = pnand %p2436_p9, %p2424_p1  ;;  %s2442_s0 = scalar_lea.vmem %s2441_s9, 256 }
  0x4b   : > { %p2443_p4 = scmp.lt.s32.totalorder %s286_s11, %s2441_s9  ;;  %p2444_p6 = scmp.lt.s32.totalorder %s2442_s0, %s2435_s20 }
  0x4c   : > { %p2439_p2 = pneg %p2438_p13 }
  0x4d   : > { %p2445_p12 = por %p2444_p6, %p2443_p4 }
  0x4f   : > { %p2446_p0 = pnand %p2445_p12, %p2439_p2 }
  0x51   : > { %2449 = shalt.err (!%p2446_p0)
}
  0x52   : > { %2175 = dma.hbm_to_vmem [thread:$0]  (!%p2764_p7), %s283_s8, 128, %s286_s11, %s274_s5  }
  0x53   : > { %s296_s2 = scalar_lea.vmem [#allocation9], %s1942_s14  ;;  %s293_s18 = scalar_lea.sflag [#allocation10], %s292_s12 }
  0x54   : > { %s304_s3 = sshll.u32 %s296_s2, 4  ;;  %s2578_s28 = smov [#allocation9]   ;;  %s305_s3 = int_to_ptr.vmem [resolvable:$true] %s304_s3 }
  0x55   : > { %s2463_s16 = scalar_lea.vmem %s305_s3, 128  ;;  %s2468_s9 = sshll.u32 %s2578_s28, 4  ;;  %s2469_s9 = int_to_ptr.vmem [resolvable:$false] %s2468_s9 }
  0x56   : > { %p2464_p3 = scmp.ne.s32.totalorder %s305_s3, %s2463_s16  ;;  %s2470_s0 = scalar_lea.vmem %s2469_s9, 256 }
  0x57   : > { %p2471_p9 = scmp.lt.s32.totalorder %s305_s3, %s2469_s9  ;;  %p2472_p13 = scmp.lt.s32.totalorder %s2470_s0, %s2463_s16 }
  0x58   : > { %p2466_p10 = pnand %p2464_p3, %p2424_p1 }
  0x59   : > { %p2473_p2 = por %p2472_p13, %p2471_p9 }
  0x5a   : > { %p2467_p11 = pneg %p2466_p10 }
  0x5c   : > { %p2474_p4 = pnand %p2473_p2, %p2467_p11 }
  0x5e   : > { %2477 = shalt.err (!%p2474_p4)
}
  0x5f   : > { %2178 = dma.hbm_to_vmem [thread:$0]  (!%p2764_p7), %s2771_s19, 128, %s305_s3, %s293_s18  }
  0x60   : > { %313 = sbr.rel (%p2699_p8) target bundleno = 1704 (0x6a8), region = 44  ;;  %s2790_s5 = sand.u32 (!%p2699_p8), 1, %s2554_s22  }
  0x61   : > { %s2793_s14 = sshll.u32 (!%p2699_p8), %s2790_s5, 3  ;;  %s316_s8 = scalar_lea.sflag (!%p2699_p8), [#allocation7], %s2790_s5 }
  0x62   : > { %s319_s11 = scalar_lea.vmem (!%p2699_p8), [#allocation6], %s2793_s14  ;;  %p3241_p1 = scmp.ne.s32.totalorder (!%p2699_p8), %s3230_s29, 0 }
  0x65   : > { %2529 = dma.done.wait (%p3241_p1), %s316_s8, 128  }
  0x66   : > { %2531 = vsyncadd (%p3241_p1), %s316_s8, 4294967168  ;;  %s324_s7 = sand.u32 1, %s2680_s27   ;;  %s328_s19 = scalar_lea.vmem [#allocation9], %s2793_s14 }
  0x67   : > { %s325_s13 = scalar_lea.sflag [#allocation10], %s324_s7 }
  0x68   : > { %2533 = dma.done.wait (%p3241_p1), %s325_s13, 128  }
  0x69   : > { %2535 = vsyncadd (%p3241_p1), %s325_s13, 4294967168  ;;  %p3242_p8 = scmp.eq.s32.totalorder %s2680_s27, 0 }
  0x6b   : > { %2537 = dma.done.wait (%p3242_p8), [#allocation10], 256   ;;  %p3243_p7 = pmov %p3242_p8 }
  0x6d   : > { %2539 = vsyncadd (%p3243_p7), [#allocation10], 4294967040  ;;  %p3244_p6 = pmov %p3243_p7 }
  0x6f   : > { %2541 = dma.done.wait (%p3244_p6), [#allocation13], 512   ;;  %p3245_p12 = pmov %p3244_p6 }
  0x70   : > { %vm402_vm0 = vcmask 261120   ;;  %v2579_v0 = vmov 0.0   ;;  %vm2580_vm1 = vmmov 0   ;;  %v2302_v1 = vld [vmem:[#allocation11 + $0x8] sm:$0xff]   ;;  %v2303_v2 = vld [vmem:[#allocation12 + $0x8] sm:$0xff]   ;;  %v2304_v3 = vld [vmem:[#allocation11] sm:$0xff]   ;;  %v386_v9 = vlaneseq }
  0x71   : > { %2543 = vsyncadd (%p3245_p12), [#allocation13], 4294966784  ;;  %2024 = vmatprep.subr.bf16.mxu0 %v2579_v0  ;;  %2032 = vmatprep.subr.bf16.mxu1 %v2579_v0  ;;  %453 = vst.msk [vmem:[#allocation5] sm:$0xff] %vm402_vm0, %v2579_v0  ;;  %v2305_v4 = vld [vmem:[#allocation12] sm:$0xff]   ;;  %v380_v5 = vld [vmem:[%s319_s11] sm:$0xff]  ;;  %vm533_vm2 = vcmask 31744  }
  0x72   : > { %2028 = vmatprep.mubr.msk.bf16.mxu0 %vm2580_vm1, %v2579_v0  ;;  %2036 = vmatprep.mubr.msk.bf16.mxu1 %vm2580_vm1, %v2579_v0  ;;  %v454_v6 = vld [vmem:[%s328_s19] sm:$0xff]  ;;  %v381_v7 = vpack.c.bf16 %v380_v5, %v380_v5  ;;  %v2833_v10 = vshrl.u32 %v386_v9, 7  ;;  %v2839_v12 = vld [vmem:[%s3221_s4] sm:$0xf]  ;;  %vm448_vm3 = vcmask 257024   ;;  %s2581_s12 = smov 124  }
  0x73   : > { %2025 = vmatpush3.bf16.msra.mxu0 %v2302_v1  ;;  %2033 = vmatpush3.bf16.msra.mxu1 %v2303_v2  ;;  %v455_v8 = vpack.c.bf16 %v454_v6, %v454_v6  ;;  %s2582_s20 = smov 120   ;;  %s2583_s2 = smov 116   ;;  %vm450_vm4 = vcmask 64512   ;;  %v2588_v57 = vmov -inf   ;;  %v2590_v61 = vmov 0  }
  0x74   : > { %2026 = vmatprep.subr.bf16.mxu0 %v2579_v0  ;;  %2034 = vmatprep.subr.bf16.mxu1 %v2579_v0  ;;  %v388_v11 = vsub.s32 0, %v2833_v10  ;;  %v518_v13 = vsub.s32 1, %v2833_v10  ;;  %s2584_s3 = smov 112   ;;  %s2585_s18 = smov 108   ;;  %452 = vst.msk [vmem:[#allocation4] sm:$0xff] %vm450_vm4, %v2579_v0  ;;  %451 = vst.msk [vmem:[#allocation3] sm:$0xff] %vm450_vm4, %v2588_v57 }
  0x75   : > { %s2586_s16 = smov 104   ;;  %s2587_s28 = smov 100   ;;  %v524_v59 = vsub.s32 2, %v2833_v10  ;;  %2278 = vset.pattern.permute.xlu1 %v2590_v61  ;;  %v2591_v9 = vmov 1   ;;  %vm603_vm5 = vcmask 7168   ;;  %vm742_vm6 = vcmask 15368  }
  0x76   : > { %v389_v14 = vrot.slane %v2839_v12, %v388_v11  ;;  %v519_v15 = vrot.slane %v2839_v12, %v518_v13  ;;  %s2589_s9 = smov 32   ;;  %2279 = vset.pattern.permute.xlu0 %v2591_v9  ;;  %vm880_vm7 = vcmask 23568   ;;  %s2594_s0 = smov 96   ;;  %vm1018_vm8 = vcmask 31768  }
  0x77   : > { %2027 = vmatpush3.bf16.msra.mxu0 %v2304_v3  ;;  %2035 = vmatpush3.bf16.msra.mxu1 %v2305_v4  ;;  %v525_v60 = vrot.slane %v2839_v12, %v524_v59  ;;  %s2596_s8 = smov 92   ;;  %s2597_s11 = smov 88   ;;  %vm1156_vm9 = vcmask 39968   ;;  %vm1294_vm10 = vcmask 48168   ;;  %vm1432_vm11 = vcmask 56368  }
  0x78   : > { %2040 = vmatprep.subr.bf16.mxu0 %v2579_v0  ;;  %2046 = vmatprep.subr.bf16.mxu1 %v2579_v0  ;;  %s2599_s7 = smov 84   ;;  %s2601_s13 = smov 80   ;;  %vm620_vm12 = vcmask 1043456   ;;  %vm1570_vm13 = vcmask 64568   ;;  %vm806_vm14 = vcmask 64544   ;;  %vm944_vm15 = vcmask 97344  }
  0x79   : > { %s2602_s19 = smov 76   ;;  %s2604_s27 = smov 72  }
  0x7a   : > { %2029 = vmatmul.mubr.msk.bf16.vlgmr.msra.gmra.mxu0 %vm402_vm0, %v381_v7  ;;  %2037 = vmatmul.mubr.msk.bf16.vlgmr.msra.gmra.mxu1 %vm402_vm0, %v455_v8  ;;  %s2605_s29 = smov 68  }
  0x7b   : > { %2042 = vmatprep.mubr.msk.bf16.mxu0 %vm2580_vm1, %v2579_v0  ;;  %2048 = vmatprep.mubr.msk.bf16.mxu1 %vm2580_vm1, %v2579_v0 }
 0x13a   : > { %v440_v16 = vpop.f32.mrf.mxu0  ;;  %v2844_v18 = vpop.f32.mrf.mxu1 }
 0x13b   : > { %v441_v17 = vadd.f32 %v440_v16, %v389_v14  ;;  %v520_v19 = vadd.f32 %v519_v15, %v2844_v18  ;;  %v2910_v15 = vld [vmem:[#allocation3] sm:$0xff] }
 0x13c   : > { %v2030_v20 = vpop.f32.mrf.mxu0  ;;  %v2038_v22 = vpop.f32.mrf.mxu1 }
 0x13d   : > { %v446_v21 = vmul.f32 0.5, %v441_v17  ;;  %v521_v23 = vpack.c.bf16 %v520_v19, %v520_v19 }
 0x13e   : > { %v443_v24 = vpop.f32.mrf.mxu0  ;;  %v513_v26 = vpop.f32.mrf.mxu1 }
 0x13f   : > { %v447_v25 = vpack.c.bf16 %v446_v21, %v446_v21  ;;  %672 = vrot.lane.b32.xlu0 %v521_v23, %s2581_s12  ;;  %v538_v28 = vsel %vm533_vm2, %v521_v23, 0  ;;  %810 = vrot.lane.b32.xlu1 %v521_v23, %s2582_s20 }
 0x140   : > { %v2031_v27 = vpop.f32.mrf.mxu0  ;;  %v2039_v29 = vpop.f32.mrf.mxu1  ;;  %2041 = vmatpush3.bf16.xpose.msra.mxu0 %v538_v28 }
 0x141   : > { %449 = vst.msk [vmem:[#allocation2] sm:$0xf] %vm448_vm3, %v447_v25  ;;  %2052 = vmatprep.subr.bf16.mxu0 %v2579_v0  ;;  %vm1220_vm3 = vcmask 162944  }
 0x148   : > { %v532_v30 = vld [vmem:[#allocation2] sm:$0xf] }
 0x149   : > { %2043 = vmatmul.mubr.msk.bf16.vlgmr.msra.gmra.mxu0 %vm533_vm2, %v532_v30  ;;  %v1961_v31 = vcombine.low %v532_v30, %v532_v30 }
 0x14a   : > { %2054 = vmatprep.mubr.msk.bf16.mxu0 %vm2580_vm1, %v2579_v0 }
 0x14b   : > { %808 = vrot.lane.b32.xlu1 %v1961_v31, %s2582_s20  ;;  %669 = vrot.lane.b32.xlu0 %v1961_v31, %s2581_s12  ;;  %s2606_s12 = smov 4   ;;  %s2607_s20 = smov 8  }
 0x14f   : > { %946 = vrot.lane.b32.xlu1 %v1961_v31, %s2583_s2  ;;  %948 = vrot.lane.b32.xlu0 %v521_v23, %s2583_s2  ;;  %s2608_s2 = smov 12  }
 0x153   : > { %1084 = vrot.lane.b32.xlu1 %v1961_v31, %s2584_s3  ;;  %1086 = vrot.lane.b32.xlu0 %v521_v23, %s2584_s3  ;;  %s2609_s3 = smov 16  }
 0x157   : > { %1222 = vrot.lane.b32.xlu1 %v1961_v31, %s2585_s18  ;;  %1224 = vrot.lane.b32.xlu0 %v521_v23, %s2585_s18  ;;  %s2610_s18 = smov 20  }
 0x15b   : > { %1360 = vrot.lane.b32.xlu1 %v1961_v31, %s2586_s16  ;;  %1362 = vrot.lane.b32.xlu0 %v521_v23, %s2586_s16  ;;  %s2611_s16 = smov 24  }
 0x15f   : > { %1498 = vrot.lane.b32.xlu1 %v1961_v31, %s2587_s28  ;;  %1500 = vrot.lane.b32.xlu0 %v521_v23, %s2587_s28  ;;  %s2612_s28 = smov 28  }
 0x1b1   : > { %v673_v32 = vpop.permute.xlu0 %672  ;;  %v811_v34 = vpop.permute.xlu1 %810 }
 0x1b2   : > { %v678_v33 = vsel %vm533_vm2, %v673_v32, 0  ;;  %v816_v36 = vsel %vm533_vm2, %v811_v34, 0  ;;  %v2592_v34 = vmov 2  }
 0x1b3   : > { %2053 = vmatpush3.bf16.xpose.msra.mxu0 %v678_v33 }
 0x1b4   : > { %2064 = vmatprep.subr.bf16.mxu0 %v2579_v0 }
 0x1bd   : > { %v670_v35 = vpop.permute.xlu0 %669  ;;  %v809_v38 = vpop.permute.xlu1 %808 }
 0x1be   : > { %2055 = vmatmul.mubr.msk.bf16.vlgmr.msra.gmra.mxu0 %vm533_vm2, %v670_v35 }
 0x1bf   : > { %2065 = vmatpush3.bf16.xpose.msra.mxu0 %v816_v36  ;;  %2066 = vmatprep.mubr.msk.bf16.mxu0 %vm2580_vm1, %v2579_v0 }
 0x1c0   : > { %2076 = vmatprep.subr.bf16.mxu0 %v2579_v0 }
 0x1c1   : > { %v949_v37 = vpop.permute.xlu0 %948  ;;  %v947_v41 = vpop.permute.xlu1 %946 }
 0x1c2   : > { %v954_v39 = vsel %vm533_vm2, %v949_v37, 0 }
 0x1c5   : > { %v1087_v40 = vpop.permute.xlu0 %1086  ;;  %v1085_v44 = vpop.permute.xlu1 %1084 }
 0x1c6   : > { %2067 = vmatmul.mubr.msk.bf16.vlgmr.msra.gmra.mxu0 %vm533_vm2, %v809_v38  ;;  %v1092_v42 = vsel %vm533_vm2, %v1087_v40, 0 }
 0x1c7   : > { %2077 = vmatpush3.bf16.xpose.msra.mxu0 %v954_v39  ;;  %2078 = vmatprep.mubr.msk.bf16.mxu0 %vm2580_vm1, %v2579_v0 }
 0x1c8   : > { %2088 = vmatprep.subr.bf16.mxu0 %v2579_v0 }
 0x1c9   : > { %v1225_v43 = vpop.permute.xlu0 %1224  ;;  %v1223_v47 = vpop.permute.xlu1 %1222 }
 0x1ca   : > { %v1230_v45 = vsel %vm533_vm2, %v1225_v43, 0 }
 0x1cd   : > { %v1363_v46 = vpop.permute.xlu0 %1362  ;;  %v1361_v50 = vpop.permute.xlu1 %1360 }
 0x1ce   : > { %2079 = vmatmul.mubr.msk.bf16.vlgmr.msra.gmra.mxu0 %vm533_vm2, %v947_v41  ;;  %v1368_v48 = vsel %vm533_vm2, %v1363_v46, 0  ;;  %v2593_v46 = vmov 5  }
 0x1cf   : > { %2089 = vmatpush3.bf16.xpose.msra.mxu0 %v1092_v42  ;;  %2090 = vmatprep.mubr.msk.bf16.mxu0 %vm2580_vm1, %v2579_v0 }
 0x1d0   : > { %2100 = vmatprep.subr.bf16.mxu0 %v2579_v0 }
 0x1d1   : > { %v1501_v49 = vpop.permute.xlu0 %1500  ;;  %v1499_v52 = vpop.permute.xlu1 %1498 }
 0x1d2   : > { %v1506_v51 = vsel %vm533_vm2, %v1501_v49, 0 }
 0x1d6   : > { %2091 = vmatmul.mubr.msk.bf16.vlgmr.msra.gmra.mxu0 %vm533_vm2, %v1085_v44 }
 0x1d7   : > { %2101 = vmatpush3.bf16.xpose.msra.mxu0 %v1230_v45  ;;  %2102 = vmatprep.mubr.msk.bf16.mxu0 %vm2580_vm1, %v2579_v0 }
 0x1d8   : > { %2112 = vmatprep.subr.bf16.mxu0 %v2579_v0 }
 0x1de   : > { %2103 = vmatmul.mubr.msk.bf16.vlgmr.msra.gmra.mxu0 %vm533_vm2, %v1223_v47 }
 0x1df   : > { %2113 = vmatpush3.bf16.xpose.msra.mxu0 %v1368_v48  ;;  %2114 = vmatprep.mubr.msk.bf16.mxu0 %vm2580_vm1, %v2579_v0 }
 0x1e0   : > { %2124 = vmatprep.subr.bf16.mxu0 %v2579_v0 }
 0x1e6   : > { %2115 = vmatmul.mubr.msk.bf16.vlgmr.msra.gmra.mxu0 %vm533_vm2, %v1361_v50 }
 0x1e7   : > { %2125 = vmatpush3.bf16.xpose.msra.mxu0 %v1506_v51  ;;  %2126 = vmatprep.mubr.msk.bf16.mxu0 %vm2580_vm1, %v2579_v0 }
 0x1e8   : > { %2136 = vmatprep.subr.bf16.mxu0 %v2579_v0 }
 0x1ee   : > { %2127 = vmatmul.mubr.msk.bf16.vlgmr.msra.gmra.mxu0 %vm533_vm2, %v1499_v52 }
 0x1ef   : > { %2140 = vmatprep.mubr.msk.bf16.mxu0 %vm2580_vm1, %v2579_v0 }
 0x209   : > { %v2889_v53 = vpop.f32.mrf.mxu0 }
 0x20a   : > { %v583_v54 = vsel %vm450_vm4, %v2889_v53, -inf }
 0x20b   : > { %584 = vmax.xlane.f32.xlu0 %v583_v54  ;;  %v2044_v55 = vpop.f32.mrf.mxu0  ;;  %v2595_v54 = vmov 3  }
 0x20d   : > { %v577_v56 = vpop.f32.mrf.mxu0 }
 0x20f   : > { %v2045_v58 = vpop.f32.mrf.mxu0 }
 0x221   : > { %527 = vrot.lane.b32.xlu0 %v525_v60, %s2589_s9  ;;  %v2598_v60 = vmov 4  }
 0x27e   : > { %v2897_v62 = vpop.f32.mrf.mxu0 }
 0x27f   : > { %v722_v63 = vsel %vm450_vm4, %v2897_v62, -inf }
 0x280   : > { %723 = vmax.xlane.f32.xlu1 %v722_v63  ;;  %v2056_v1 = vpop.f32.mrf.mxu0 }
 0x282   : > { %v717_v2 = vpop.f32.mrf.mxu0 }
 0x284   : > { %v2057_v3 = vpop.f32.mrf.mxu0 }
 0x285   : > { %v2600_v3 = vmov 6  }
 0x286   : > { %v2901_v4 = vpop.f32.mrf.mxu0 }
 0x287   : > { %v860_v5 = vsel %vm450_vm4, %v2901_v4, -inf }
 0x288   : > { %861 = vmax.xlane.f32.xlu0 %v860_v5  ;;  %v2068_v6 = vpop.f32.mrf.mxu0 }
 0x28a   : > { %v855_v7 = vpop.f32.mrf.mxu0 }
 0x28c   : > { %v2069_v8 = vpop.f32.mrf.mxu0 }
 0x28e   : > { %v2906_v11 = vpop.f32.mrf.mxu0 }
 0x28f   : > { %v998_v12 = vsel %vm450_vm4, %v2906_v11, -inf }
 0x290   : > { %999 = vmax.xlane.f32.xlu1 %v998_v12  ;;  %v2080_v13 = vpop.f32.mrf.mxu0 }
 0x292   : > { %v993_v14 = vpop.f32.mrf.mxu0 }
 0x294   : > { %v585_v16 = vpop.xlane.xlu0 %584  ;;  %v2081_v17 = vpop.f32.mrf.mxu0 }
 0x295   : > { %v2913_v19 = vmax.f32 %v2910_v15, %v585_v16 }
 0x296   : > { %v2915_v20 = vpop.f32.mrf.mxu0 }
 0x297   : > { %v587_v21 = vsub.f32 %v2910_v15, %v2913_v19  ;;  %605 = vst.msk [vmem:[#allocation3] sm:$0xff] %vm603_vm5, %v2913_v19  ;;  %v1136_v22 = vsel %vm450_vm4, %v2915_v20, -inf }
 0x298   : > { %1137 = vmax.xlane.f32.xlu1 %v1136_v22  ;;  %v2092_v23 = vpop.f32.mrf.mxu0  ;;  %v528_v45 = vpop.permute.xlu0 %527  ;;  %v2603_v22 = vmov 7  }
 0x299   : > { %v530_v49 = vadd.f32 %v528_v45, %v2844_v18 }
 0x29a   : > { %v1131_v24 = vpop.f32.mrf.mxu0 }
 0x29b   : > { %v2957_v52 = vpack.c.bf16 %v530_v49, %v530_v49 }
 0x29c   : > { %v2093_v25 = vpop.f32.mrf.mxu0 }
 0x29e   : > { %v2923_v26 = vpop.f32.mrf.mxu0  ;;  %v2935_v41 = vld [vmem:[#allocation3] sm:$0xff] }
 0x29f   : > { %v1274_v39 = vsel %vm450_vm4, %v2923_v26, -inf }
 0x2a0   : > { %v2104_v27 = vpop.f32.mrf.mxu0 }
 0x2a2   : > { %v1269_v28 = vpop.f32.mrf.mxu0 }
 0x2a4   : > { %v2105_v29 = vpop.f32.mrf.mxu0 }
 0x2a6   : > { %v2925_v30 = vpop.f32.mrf.mxu0 }
 0x2a7   : > { %v1412_v40 = vsel %vm450_vm4, %v2925_v30, -inf }
 0x2a8   : > { %v2116_v31 = vpop.f32.mrf.mxu0 }
 0x2a9   : > { %592 = vperm.xlu1 %2278, %v2913_v19  }
 0x2aa   : > { %v1407_v32 = vpop.f32.mrf.mxu0 }
 0x2ac   : > { %v2117_v33 = vpop.f32.mrf.mxu0 }
 0x2ad   : > { %2280 = vset.pattern.permute.xlu1 %v2592_v34 }
 0x2ae   : > { %v2929_v35 = vpop.f32.mrf.mxu0 }
 0x2af   : > { %v1550_v2 = vsel %vm450_vm4, %v2929_v35, -inf }
 0x2b0   : > { %v2128_v36 = vpop.f32.mrf.mxu0 }
 0x2b2   : > { %v1545_v37 = vpop.f32.mrf.mxu0 }
 0x2b4   : > { %v2129_v38 = vpop.f32.mrf.mxu0 }
 0x2cd   : > { %1275 = vmax.xlane.f32.xlu1 %v1274_v39 }
 0x2d1   : > { %1413 = vmax.xlane.f32.xlu1 %v1412_v40 }
 0x309   : > { %v724_v42 = vpop.xlane.xlu1 %723 }
 0x30a   : > { %v2938_v43 = vmax.f32 %v2935_v41, %v724_v42 }
 0x30c   : > { %v726_v44 = vsub.f32 %v2935_v41, %v2938_v43  ;;  %744 = vst.msk [vmem:[#allocation3] sm:$0xff] %vm742_vm6, %v2938_v43  ;;  %731 = vperm.xlu0 %2279, %v2938_v43  }
 0x30e   : > { %v727_v15 = vmul.f32 1.442695, %v726_v44 }
 0x310   : > { %2283 = vset.pattern.permute.xlu0 %v2593_v46 }
 0x311   : > { %v862_v48 = vpop.xlane.xlu0 %861 }
 0x313   : > { %v2946_v47 = vld [vmem:[#allocation3] sm:$0xff] }
 0x314   : > { %v2950_v50 = vmax.f32 %v2946_v47, %v862_v48 }
 0x316   : > { %v864_v51 = vsub.f32 %v2946_v47, %v2950_v50  ;;  %882 = vst.msk [vmem:[#allocation3] sm:$0xff] %vm880_vm7, %v2950_v50  ;;  %869 = vperm.xlu1 %2280, %v2950_v50  }
 0x318   : > { %v865_v19 = vmul.f32 1.442695, %v864_v51 }
 0x319   : > { %v1000_v55 = vpop.xlane.xlu1 %999 }
 0x31a   : > { %615 = vrot.lane.b32.xlu1 %v2957_v52, %s2594_s0 }
 0x31b   : > { %2281 = vset.pattern.permute.xlu1 %v2595_v54 }
 0x31d   : > { %v2961_v18 = vld [vmem:[#allocation3] sm:$0xff] }
 0x31e   : > { %v2964_v56 = vmax.f32 %v2961_v18, %v1000_v55  ;;  %753 = vrot.lane.b32.xlu1 %v2957_v52, %s2596_s8  ;;  %s1980_s8 = sshll.u32 %s2562_s24, 7 }
 0x320   : > { %v1002_v57 = vsub.f32 %v2961_v18, %v2964_v56  ;;  %1020 = vst.msk [vmem:[#allocation3] sm:$0xff] %vm1018_vm8, %v2964_v56 }
 0x321   : > { %v1138_v59 = vpop.xlane.xlu1 %1137 }
 0x322   : > { %1007 = vperm.xlu1 %2281, %v2964_v56  }
 0x325   : > { %v593_v5 = vpop.permute.xlu1 %592 }
 0x326   : > { %891 = vrot.lane.b32.xlu1 %v2957_v52, %s2597_s11  ;;  %v595_v23 = vsub.f32 %v2889_v53, %v593_v5  ;;  %s373_s11 = scalar_lea.vmem [#allocation15], %s2793_s14  ;;  %s2613_s14 = smov [#allocation15]  }
 0x327   : > { %v2973_v58 = vld [vmem:[#allocation3] sm:$0xff]  ;;  %2282 = vset.pattern.permute.xlu1 %v2598_v60 }
 0x328   : > { %v2977_v63 = vmax.f32 %v2973_v58, %v1138_v59  ;;  %v596_v24 = vmul.f32 1.442695, %v595_v23 }
 0x32a   : > { %v1140_v1 = vsub.f32 %v2973_v58, %v2977_v63  ;;  %1158 = vst.msk [vmem:[#allocation3] sm:$0xff] %vm1156_vm9, %v2977_v63  ;;  %1145 = vperm.xlu1 %2282, %v2977_v63   ;;  %2309 = vpow2.f32 %v596_v24 }
 0x32b   : > { %1551 = vmax.xlane.f32.xlu0 %v1550_v2 }
 0x32e   : > { %1029 = vrot.lane.b32.xlu1 %v2957_v52, %s2599_s7  ;;  %s1800_s7 = sshll.u32 %s373_s11, 4  ;;  %s3170_s7 = int_to_ptr.vmem [resolvable:$true] %s1800_s7 }
 0x32f   : > { %2284 = vset.pattern.permute.xlu1 %v2600_v3  ;;  %s2478_s24 = scalar_lea.vmem %s3170_s7, 128 }
 0x330   : > { %p2479_p0 = scmp.ne.s32.totalorder %s3170_s7, %s2478_s24 }
 0x331   : > { %v2989_v6 = vld [vmem:[#allocation3] sm:$0xff] }
 0x332   : > { %1167 = vrot.lane.b32.xlu1 %v2957_v52, %s2601_s13  ;;  %p2480_p3 = pnand %p2479_p0, %p2745_p5 }
 0x334   : > { %p2481_p10 = pneg %p2480_p3 }
 0x337   : > { %v3015_v33 = vpop.eup %2309 }
 0x338   : > { %v613_v53 = vpack.c.bf16 %v3015_v33, %v3015_v33 }
 0x356   : > { %v1276_v7 = vpop.xlane.xlu1 %1275 }
 0x357   : > { %v2992_v8 = vmax.f32 %v2989_v6, %v1276_v7 }
 0x359   : > { %v1278_v12 = vsub.f32 %v2989_v6, %v2992_v8  ;;  %1296 = vst.msk [vmem:[#allocation3] sm:$0xff] %vm1294_vm10, %v2992_v8  ;;  %1283 = vperm.xlu0 %2283, %v2992_v8  }
 0x35a   : > { %v1414_v14 = vpop.xlane.xlu1 %1413 }
 0x35d   : > { %2287 = vset.pattern.permute.xlu0 %v2591_v9 }
 0x360   : > { %v3000_v13 = vld [vmem:[#allocation3] sm:$0xff] }
 0x361   : > { %v3003_v16 = vmax.f32 %v3000_v13, %v1414_v14 }
 0x363   : > { %v1416_v17 = vsub.f32 %v3000_v13, %v3003_v16  ;;  %1434 = vst.msk [vmem:[#allocation3] sm:$0xff] %vm1432_vm11, %v3003_v16  ;;  %1421 = vperm.xlu1 %2284, %v3003_v16  }
 0x365   : > { %v1417_v18 = vmul.f32 1.442695, %v1416_v17 }
 0x367   : > { %1305 = vrot.lane.b32.xlu1 %v2957_v52, %s2602_s19 }
 0x368   : > { %2285 = vset.pattern.permute.xlu1 %v2603_v22 }
 0x387   : > { %v732_v25 = vpop.permute.xlu0 %731 }
 0x388   : > { %v734_v27 = vsub.f32 %v2897_v62, %v732_v25 }
 0x38a   : > { %v735_v28 = vmul.f32 1.442695, %v734_v27 }
 0x38c   : > { %2311 = vpow2.f32 %v735_v28 }
 0x391   : > { %v870_v29 = vpop.permute.xlu1 %869 }
 0x392   : > { %v872_v31 = vsub.f32 %v2901_v4, %v870_v29 }
 0x394   : > { %v873_v32 = vmul.f32 1.442695, %v872_v31 }
 0x395   : > { %v616_v36 = vpop.permute.xlu1 %615 }
 0x396   : > { %2313 = vpow2.f32 %v873_v32  ;;  %v622_v37 = vsel %vm620_vm12, %v616_v36, 0 }
 0x397   : > { %2047 = vmatpush3.bf16.msra.mxu1 %v622_v37 }
 0x398   : > { %2058 = vmatprep.subr.bf16.mxu1 %v2579_v0 }
 0x399   : > { %v2312_v62 = vpop.eup %2311  ;;  %v754_v38 = vpop.permute.xlu1 %753 }
 0x39a   : > { %v759_v39 = vsel %vm620_vm12, %v754_v38, 0  ;;  %2049 = vmatmul.mubr.msk.bf16.vlgmr.msra.gmra.mxu1 %vm450_vm4, %v613_v53  ;;  %v738_v4 = vsel %vm450_vm4, %v2312_v62, 0.0  ;;  %v752_v48 = vpack.c.bf16 %v2312_v62, %v2312_v62 }
 0x39b   : > { %2059 = vmatpush3.bf16.msra.mxu1 %v759_v39  ;;  %739 = vadd.xlane.f32.xlu0 %v738_v4 }
 0x39c   : > { %2060 = vmatprep.mubr.msk.bf16.mxu1 %vm2580_vm1, %v2579_v0  ;;  %2070 = vmatprep.subr.bf16.mxu1 %v2579_v0 }
 0x39d   : > { %v1008_v40 = vpop.permute.xlu1 %1007 }
 0x39e   : > { %v1010_v42 = vsub.f32 %v2906_v11, %v1008_v40 }
 0x3a0   : > { %v1011_v45 = vmul.f32 1.442695, %v1010_v42  ;;  %v588_v42 = vmul.f32 1.442695, %v587_v21 }
 0x3a1   : > { %v892_v49 = vpop.permute.xlu1 %891 }
 0x3a2   : > { %2315 = vpow2.f32 %v1011_v45  ;;  %v897_v55 = vsel %vm620_vm12, %v892_v49, 0  ;;  %2061 = vmatmul.mubr.msk.bf16.vlgmr.msra.gmra.mxu1 %vm450_vm4, %v752_v48  ;;  %v599_v48 = vsel %vm450_vm4, %v3015_v33, 0.0 }
 0x3a3   : > { %v2314_v59 = vpop.eup %2313  ;;  %2071 = vmatpush3.bf16.msra.mxu1 %v897_v55  ;;  %2072 = vmatprep.mubr.msk.bf16.mxu1 %vm2580_vm1, %v2579_v0 }
 0x3a4   : > { %v876_v2 = vsel %vm450_vm4, %v2314_v59, 0.0  ;;  %2082 = vmatprep.subr.bf16.mxu1 %v2579_v0  ;;  %v890_v14 = vpack.c.bf16 %v2314_v59, %v2314_v59 }
 0x3a5   : > { %v1146_v5 = vpop.permute.xlu1 %1145  ;;  %877 = vadd.xlane.f32.xlu0 %v876_v2 }
 0x3a6   : > { %v1148_v11 = vsub.f32 %v2915_v20, %v1146_v5  ;;  %v3044_v20 = vld [vmem:[#allocation3] sm:$0xff] }
 0x3a8   : > { %v1149_v7 = vmul.f32 1.442695, %v1148_v11 }
 0x3a9   : > { %v1030_v23 = vpop.permute.xlu1 %1029 }
 0x3aa   : > { %2317 = vpow2.f32 %v1149_v7  ;;  %v1035_v24 = vsel %vm620_vm12, %v1030_v23, 0  ;;  %2073 = vmatmul.mubr.msk.bf16.vlgmr.msra.gmra.mxu1 %vm450_vm4, %v890_v14 }
 0x3ab   : > { %2083 = vmatpush3.bf16.msra.mxu1 %v1035_v24  ;;  %2084 = vmatprep.mubr.msk.bf16.mxu1 %vm2580_vm1, %v2579_v0 }
 0x3ac   : > { %2094 = vmatprep.subr.bf16.mxu1 %v2579_v0 }
 0x3ad   : > { %v1168_v27 = vpop.permute.xlu1 %1167 }
 0x3ae   : > { %v1173_v29 = vsel %vm620_vm12, %v1168_v27, 0  ;;  %v1141_v27 = vmul.f32 1.442695, %v1140_v1  ;;  %v581_v1 = vld [vmem:[#allocation4] sm:$0xff] }
 0x3af   : > { %v2316_v25 = vpop.eup %2315 }
 0x3b0   : > { %v1028_v28 = vpack.c.bf16 %v2316_v25, %v2316_v25  ;;  %v1014_v44 = vsel %vm450_vm4, %v2316_v25, 0.0  ;;  %v1003_v25 = vmul.f32 1.442695, %v1002_v57 }
 0x3b2   : > { %2085 = vmatmul.mubr.msk.bf16.vlgmr.msra.gmra.mxu1 %vm450_vm4, %v1028_v28 }
 0x3b3   : > { %2095 = vmatpush3.bf16.msra.mxu1 %v1173_v29  ;;  %2096 = vmatprep.mubr.msk.bf16.mxu1 %vm2580_vm1, %v2579_v0 }
 0x3b4   : > { %v1552_v31 = vpop.xlane.xlu0 %1551  ;;  %2106 = vmatprep.subr.bf16.mxu1 %v2579_v0 }
 0x3b5   : > { %v3048_v32 = vmax.f32 %v3044_v20, %v1552_v31 }
 0x3b7   : > { %v2318_v36 = vpop.eup %2317  ;;  %v1554_v37 = vsub.f32 %v3044_v20, %v3048_v32  ;;  %1572 = vst.msk [vmem:[#allocation3] sm:$0xff] %vm1570_vm13, %v3048_v32  ;;  %1559 = vperm.xlu1 %2285, %v3048_v32  }
 0x3b8   : > { %v1152_v53 = vsel %vm450_vm4, %v2318_v36, 0.0  ;;  %v1166_v62 = vpack.c.bf16 %v2318_v36, %v2318_v36  ;;  %v1279_v36 = vmul.f32 1.442695, %v1278_v12 }
 0x3b9   : > { %1153 = vadd.xlane.f32.xlu0 %v1152_v53  ;;  %v1555_v6 = vmul.f32 1.442695, %v1554_v37 }
 0x3ba   : > { %2097 = vmatmul.mubr.msk.bf16.vlgmr.msra.gmra.mxu1 %vm450_vm4, %v1166_v62 }
 0x3bb   : > { %1443 = vrot.lane.b32.xlu1 %v2957_v52, %s2604_s27  ;;  %2108 = vmatprep.mubr.msk.bf16.mxu1 %vm2580_vm1, %v2579_v0  ;;  %s3168_s27 = scalar_lea.hbm %s3223_s6, %s1980_s8 }
 0x3bc   : > { %2286 = vset.pattern.permute.xlu1 %v2590_v61 }
 0x3bf   : > { %1581 = vrot.lane.b32.xlu1 %v2957_v52, %s2605_s29  ;;  %s1786_s29 = scalar_lea.sflag [#allocation8], %s2790_s5 }
 0x3d4   : > { %v1284_v38 = vpop.permute.xlu0 %1283 }
 0x3d5   : > { %v1286_v39 = vsub.f32 %v2923_v26, %v1284_v38 }
 0x3d7   : > { %v1287_v4 = vmul.f32 1.442695, %v1286_v39 }
 0x3d9   : > { %2319 = vpow2.f32 %v1287_v4  ;;  %v606_v4 = vld [vmem:[#allocation5] sm:$0xff] }
 0x3da   : > { %2321 = vpow2.f32 %v588_v42 }
 0x3db   : > { %2323 = vpow2.f32 %v727_v15 }
 0x3dc   : > { %2325 = vpow2.f32 %v865_v19 }
 0x3de   : > { %v1422_v40 = vpop.permute.xlu1 %1421 }
 0x3df   : > { %v1424_v41 = vsub.f32 %v2925_v30, %v1422_v40 }
 0x3e1   : > { %v1425_v43 = vmul.f32 1.442695, %v1424_v41 }
 0x3e2   : > { %v1306_v45 = vpop.permute.xlu1 %1305 }
 0x3e3   : > { %v1311_v49 = vsel %vm620_vm12, %v1306_v45, 0  ;;  %600 = vadd.xlane.f32.xlu1 %v599_v48  ;;  %2327 = vpow2.f32 %v1425_v43 }
 0x3e4   : > { %2107 = vmatpush3.bf16.msra.mxu1 %v1311_v49 }
 0x3e5   : > { %2118 = vmatprep.subr.bf16.mxu1 %v2579_v0 }
 0x3e6   : > { %v2320_v52 = vpop.eup %2319 }
 0x3e7   : > { %v1290_v26 = vsel %vm450_vm4, %v2320_v52, 0.0  ;;  %v1304_v55 = vpack.c.bf16 %v2320_v52, %v2320_v52  ;;  %v3080_v21 = vpop.eup %2321 }
 0x3e8   : > { %1291 = vadd.xlane.f32.xlu0 %v1290_v26  ;;  %v3084_v33 = vpop.eup %2323  ;;  %v598_v13 = vmul.f32 %v3080_v21, %v581_v1 }
 0x3e9   : > { %2109 = vmatmul.mubr.msk.bf16.vlgmr.msra.gmra.mxu1 %vm450_vm4, %v1304_v55  ;;  %v3087_v59 = vpop.eup %2325 }
 0x3ea   : > { %2120 = vmatprep.mubr.msk.bf16.mxu1 %vm2580_vm1, %v2579_v0 }
 0x3f0   : > { %v2328_v47 = vpop.eup %2327 }
 0x3f1   : > { %v1428_v50 = vsel %vm450_vm4, %v2328_v47, 0.0  ;;  %v1442_v7 = vpack.c.bf16 %v2328_v47, %v2328_v47 }
 0x3f4   : > { %609 = vperm.xlu1 %2286, %v3080_v21  }
 0x3f8   : > { %2289 = vset.pattern.permute.xlu1 %v2595_v54 }
 0x3fe   : > { %748 = vperm.xlu0 %2287, %v3084_v33  }
 0x402   : > { %2288 = vset.pattern.permute.xlu0 %v2592_v34 }
 0x403   : > { %886 = vperm.xlu0 %2288, %v3087_v59  }
 0x407   : > { %2295 = vset.pattern.permute.xlu0 %v2591_v9 }
 0x418   : > { %1015 = vadd.xlane.f32.xlu1 %v1014_v44 }
 0x41c   : > { %1429 = vadd.xlane.f32.xlu1 %v1428_v50 }
 0x424   : > { %v740_v15 = vpop.xlane.xlu0 %739 }
 0x432   : > { %v1560_v51 = vpop.permute.xlu1 %1559 }
 0x433   : > { %v1562_v2 = vsub.f32 %v2929_v35, %v1560_v51 }
 0x435   : > { %v1563_v5 = vmul.f32 1.442695, %v1562_v2  ;;  %v878_v2 = vpop.xlane.xlu0 %877 }
 0x436   : > { %v1444_v11 = vpop.permute.xlu1 %1443 }
 0x437   : > { %2329 = vpow2.f32 %v1563_v5  ;;  %v1449_v30 = vsel %vm620_vm12, %v1444_v11, 0 }
 0x438   : > { %2119 = vmatpush3.bf16.msra.mxu1 %v1449_v30  ;;  %2331 = vpow2.f32 %v1003_v25 }
 0x439   : > { %2130 = vmatprep.subr.bf16.mxu1 %v2579_v0  ;;  %2333 = vpow2.f32 %v1141_v27 }
 0x43a   : > { %v1582_v9 = vpop.permute.xlu1 %1581  ;;  %2335 = vpow2.f32 %v1279_v36 }
 0x43b   : > { %v1587_v14 = vsel %vm620_vm12, %v1582_v9, 0  ;;  %2121 = vmatmul.mubr.msk.bf16.vlgmr.msra.gmra.mxu1 %vm450_vm4, %v1442_v7  ;;  %2337 = vpow2.f32 %v1417_v18 }
 0x43c   : > { %2131 = vmatpush3.bf16.msra.mxu1 %v1587_v14  ;;  %2132 = vmatprep.mubr.msk.bf16.mxu1 %vm2580_vm1, %v2579_v0  ;;  %2339 = vpow2.f32 %v1555_v6  ;;  %vm1082_vm1 = vcmask 130144  }
 0x444   : > { %v2330_v23 = vpop.eup %2329 }
 0x445   : > { %v1566_v35 = vsel %vm450_vm4, %v2330_v23, 0.0  ;;  %v1580_v24 = vpack.c.bf16 %v2330_v23, %v2330_v23  ;;  %v2332_v57 = vpop.eup %2331 }
 0x446   : > { %1567 = vadd.xlane.f32.xlu1 %v1566_v35  ;;  %v2334_v12 = vpop.eup %2333 }
 0x447   : > { %2133 = vmatmul.mubr.msk.bf16.vlgmr.msra.gmra.mxu1 %vm450_vm4, %v1580_v24  ;;  %v2336_v40 = vpop.eup %2335  ;;  %v1154_v24 = vpop.xlane.xlu0 %1153  ;;  %vm1358_vm4 = vcmask 195744  }
 0x448   : > { %v2338_v49 = vpop.eup %2337 }
 0x449   : > { %v2340_v41 = vpop.eup %2339 }
 0x45a   : > { %v658_v28 = vpop.f32.mrf.mxu1 }
 0x45c   : > { %v2050_v29 = vpop.f32.mrf.mxu1 }
 0x45e   : > { %v661_v31 = vpop.f32.mrf.mxu1 }
 0x460   : > { %v2051_v53 = vpop.f32.mrf.mxu1 }
 0x462   : > { %v795_v62 = vpop.f32.mrf.mxu1 }
 0x463   : > { %802 = vrot.lane.b32.xlu1 %v795_v62, %s2606_s12  ;;  %s2482_s12 = sshll.u32 %s2613_s14, 4  ;;  %s2483_s12 = int_to_ptr.vmem [resolvable:$false] %s2482_s12 }
 0x464   : > { %v2062_v56 = vpop.f32.mrf.mxu1  ;;  %p2485_p11 = scmp.lt.s32.totalorder %s3170_s7, %s2483_s12 }
 0x466   : > { %v798_v58 = vpop.f32.mrf.mxu1 }
 0x467   : > { %1024 = vperm.xlu1 %2289, %v2332_v57  }
 0x468   : > { %v2063_v63 = vpop.f32.mrf.mxu1 }
 0x46a   : > { %v933_v8 = vpop.f32.mrf.mxu1 }
 0x46b   : > { %2290 = vset.pattern.permute.xlu1 %v2598_v60  ;;  %940 = vrot.lane.b32.xlu0 %v933_v8, %s2607_s20  ;;  %s2484_s20 = scalar_lea.vmem %s2483_s12, 256 }
 0x46c   : > { %v2074_v16 = vpop.f32.mrf.mxu1  ;;  %1162 = vperm.xlu1 %2290, %v2334_v12   ;;  %v601_v17 = vpop.xlane.xlu1 %600  ;;  %p2486_p9 = scmp.lt.s32.totalorder %s2484_s20, %s2478_s24 }
 0x46d   : > { %v602_v38 = vadd.f32 %v601_v17, %v598_v13 }
 0x46e   : > { %v936_v39 = vpop.f32.mrf.mxu1  ;;  %p2487_p13 = por %p2486_p9, %p2485_p11 }
 0x46f   : > { %604 = vst.msk [vmem:[#allocation4] sm:$0xff] %vm603_vm5, %v602_v38  ;;  %vm1496_vm5 = vcmask 228544  }
 0x470   : > { %v2075_v20 = vpop.f32.mrf.mxu1  ;;  %2291 = vset.pattern.permute.xlu1 %v2593_v46  ;;  %v610_v32 = vpop.permute.xlu1 %609  ;;  %p2488_p2 = pnand %p2487_p13, %p2481_p10 }
 0x471   : > { %v612_v37 = vmul.f32 %v610_v32, %v606_v4  ;;  %1300 = vperm.xlu1 %2291, %v2336_v40   ;;  %v1292_v31 = vpop.xlane.xlu0 %1291 }
 0x472   : > { %v1071_v42 = vpop.f32.mrf.mxu1 }
 0x473   : > { %v664_v45 = vadd.f32 %v658_v28, %v612_v37  ;;  %1078 = vrot.lane.b32.xlu0 %v1071_v42, %s2608_s2 }
 0x474   : > { %v2086_v48 = vpop.f32.mrf.mxu1 }
 0x475   : > { %665 = vst.msk [vmem:[#allocation5] sm:$0xff] %vm533_vm2, %v664_v45  ;;  %2292 = vset.pattern.permute.xlu1 %v2600_v3 }
 0x476   : > { %v721_v52 = vld [vmem:[#allocation4] sm:$0xff]  ;;  %v1074_v26 = vpop.f32.mrf.mxu1  ;;  %1438 = vperm.xlu1 %2292, %v2338_v49  }
 0x477   : > { %v737_v55 = vmul.f32 %v3084_v33, %v721_v52 }
 0x478   : > { %v2087_v19 = vpop.f32.mrf.mxu1 }
 0x479   : > { %v741_v21 = vadd.f32 %v740_v15, %v737_v55  ;;  %v749_v8 = vpop.permute.xlu0 %748 }
 0x47a   : > { %v1209_v43 = vpop.f32.mrf.mxu1  ;;  %2293 = vset.pattern.permute.xlu1 %v2603_v22 }
 0x47b   : > { %743 = vst.msk [vmem:[#allocation4] sm:$0xff] %vm742_vm6, %v741_v21  ;;  %1576 = vperm.xlu1 %2293, %v2340_v41   ;;  %1216 = vrot.lane.b32.xlu0 %v1209_v43, %s2609_s3  ;;  %vm1634_vm6 = vcmask 261344  }
 0x47c   : > { %v2098_v44 = vpop.f32.mrf.mxu1  ;;  %v745_v63 = vld [vmem:[#allocation5] sm:$0xff] }
 0x47e   : > { %v1212_v47 = vpop.f32.mrf.mxu1  ;;  %v887_v38 = vpop.permute.xlu0 %886 }
 0x47f   : > { %2294 = vset.pattern.permute.xlu1 %v2590_v61 }
 0x480   : > { %v2099_v50 = vpop.f32.mrf.mxu1 }
 0x482   : > { %v859_v51 = vld [vmem:[#allocation4] sm:$0xff] }
 0x483   : > { %v875_v33 = vmul.f32 %v3087_v59, %v859_v51 }
 0x485   : > { %v879_v5 = vadd.f32 %v878_v2, %v875_v33 }
 0x487   : > { %881 = vst.msk [vmem:[#allocation4] sm:$0xff] %vm880_vm7, %v879_v5  ;;  %v2307_v5 = vld [vmem:[#allocation14 + $0x8] sm:$0xff]  }
 0x488   : > { %2137 = vmatpush3.bf16.msra.mxu0 %v2307_v5 }
 0x489   : > { %2138 = vmatprep.subr.bf16.mxu0 %v2579_v0 }
 0x48e   : > { %v997_v11 = vld [vmem:[#allocation4] sm:$0xff] }
 0x48f   : > { %v1013_v30 = vmul.f32 %v2332_v57, %v997_v11  ;;  %v2308_v11 = vld [vmem:[#allocation14] sm:$0xff]  }
 0x490   : > { %2139 = vmatpush3.bf16.msra.mxu0 %v2308_v11 }
 0x4a1   : > { %v1016_v7 = vpop.xlane.xlu1 %1015 }
 0x4a2   : > { %v1017_v9 = vadd.f32 %v1016_v7, %v1013_v30 }
 0x4a4   : > { %1019 = vst.msk [vmem:[#allocation4] sm:$0xff] %vm1018_vm8, %v1017_v9 }
 0x4a5   : > { %v1430_v18 = vpop.xlane.xlu1 %1429 }
 0x4a9   : > { %v1347_v14 = vpop.f32.mrf.mxu1 }
 0x4aa   : > { %1354 = vrot.lane.b32.xlu0 %v1347_v14, %s2610_s18 }
 0x4ab   : > { %v1135_v23 = vld [vmem:[#allocation4] sm:$0xff]  ;;  %v2110_v35 = vpop.f32.mrf.mxu1 }
 0x4ac   : > { %v1151_v61 = vmul.f32 %v2334_v12, %v1135_v23  ;;  %v751_v12 = vmul.f32 %v749_v8, %v745_v63 }
 0x4ad   : > { %v1350_v25 = vpop.f32.mrf.mxu1 }
 0x4ae   : > { %v1155_v27 = vadd.f32 %v1154_v24, %v1151_v61 }
 0x4af   : > { %v2111_v59 = vpop.f32.mrf.mxu1 }
 0x4b0   : > { %1157 = vst.msk [vmem:[#allocation4] sm:$0xff] %vm1156_vm9, %v1155_v27 }
 0x4b7   : > { %v1273_v28 = vld [vmem:[#allocation4] sm:$0xff] }
 0x4b8   : > { %v1289_v29 = vmul.f32 %v2336_v40, %v1273_v28 }
 0x4ba   : > { %v1293_v36 = vadd.f32 %v1292_v31, %v1289_v29 }
 0x4bc   : > { %1295 = vst.msk [vmem:[#allocation4] sm:$0xff] %vm1294_vm10, %v1293_v36 }
 0x4c3   : > { %v1411_v53 = vld [vmem:[#allocation4] sm:$0xff] }
 0x4c4   : > { %v1427_v62 = vmul.f32 %v2338_v49, %v1411_v53 }
 0x4c6   : > { %v1431_v56 = vadd.f32 %v1430_v18, %v1427_v62 }
 0x4c8   : > { %1433 = vst.msk [vmem:[#allocation4] sm:$0xff] %vm1432_vm11, %v1431_v56 }
 0x4cf   : > { %v1549_v57 = vld [vmem:[#allocation4] sm:$0xff]  ;;  %v1568_v1 = vpop.xlane.xlu1 %1567 }
 0x4d0   : > { %v1565_v58 = vmul.f32 %v2340_v41, %v1549_v57 }
 0x4d2   : > { %v1569_v6 = vadd.f32 %v1568_v1, %v1565_v58 }
 0x4d4   : > { %1571 = vst.msk [vmem:[#allocation4] sm:$0xff] %vm1570_vm13, %v1569_v6 }
 0x4d5   : > { %v803_v13 = vpop.permute.xlu1 %802 }
 0x4d6   : > { %v805_v16 = vadd.f32 %v803_v13, %v751_v12 }
 0x4d8   : > { %807 = vst.msk [vmem:[#allocation5] sm:$0xff] %vm806_vm14, %v805_v16 }
 0x4db   : > { %v1639_v17 = vld [vmem:[#allocation4] sm:$0xff] }
 0x4dc   : > { %2341 = vrcp.f32 %v1639_v17 }
 0x4dd   : > { %v941_v40 = vpop.permute.xlu0 %940 }
 0x4df   : > { %v883_v39 = vld [vmem:[#allocation5] sm:$0xff] }
 0x4e0   : > { %v889_v4 = vmul.f32 %v887_v38, %v883_v39 }
 0x4e2   : > { %v943_v20 = vadd.f32 %v941_v40, %v889_v4  ;;  %v1025_v37 = vpop.permute.xlu1 %1024 }
 0x4e4   : > { %945 = vst.msk [vmem:[#allocation5] sm:$0xff] %vm944_vm15, %v943_v20  ;;  %v1727_v20 = vsub.s32 3, %v2833_v10 }
 0x4e5   : > { %v1079_v48 = vpop.permute.xlu0 %1078 }
 0x4e7   : > { %v1163_v52 = vpop.permute.xlu1 %1162 }
 0x4e9   : > { %v2342_v32 = vpop.eup %2341 }
 0x4ea   : > { %1644 = vperm.xlu1 %2294, %v2342_v32  }
 0x4eb   : > { %v1021_v42 = vld [vmem:[#allocation5] sm:$0xff] }
 0x4ec   : > { %v1027_v45 = vmul.f32 %v1025_v37, %v1021_v42  ;;  %v1301_v51 = vpop.permute.xlu1 %1300 }
 0x4ed   : > { %v1217_v15 = vpop.permute.xlu0 %1216 }
 0x4ee   : > { %v1081_v49 = vadd.f32 %v1079_v48, %v1027_v45  ;;  %2296 = vset.pattern.permute.xlu1 %v2592_v34 }
 0x4ef   : > { %1664 = vperm.xlu1 %2296, %v2342_v32  }
 0x4f0   : > { %1083 = vst.msk [vmem:[#allocation5] sm:$0xff] %vm1082_vm1, %v1081_v49 }
 0x4f3   : > { %2297 = vset.pattern.permute.xlu1 %v2595_v54 }
 0x4f4   : > { %1674 = vperm.xlu1 %2297, %v2342_v32  }
 0x4f7   : > { %v1159_v26 = vld [vmem:[#allocation5] sm:$0xff] }
 0x4f8   : > { %v1165_v55 = vmul.f32 %v1163_v52, %v1159_v26  ;;  %2299 = vset.pattern.permute.xlu1 %v2593_v46 }
 0x4f9   : > { %1694 = vperm.xlu1 %2299, %v2342_v32  }
 0x4fa   : > { %v1219_v19 = vadd.f32 %v1217_v15, %v1165_v55 }
 0x4fb   : > { %v1485_v21 = vpop.f32.mrf.mxu1 }
 0x4fc   : > { %1221 = vst.msk [vmem:[#allocation5] sm:$0xff] %vm1220_vm3, %v1219_v19  ;;  %1492 = vrot.lane.b32.xlu0 %v1485_v21, %s2611_s16 }
 0x4fd   : > { %v2122_v34 = vpop.f32.mrf.mxu1  ;;  %2300 = vset.pattern.permute.xlu1 %v2600_v3 }
 0x4fe   : > { %1704 = vperm.xlu1 %2300, %v2342_v32  }
 0x4ff   : > { %v1488_v54 = vpop.f32.mrf.mxu1 }
 0x501   : > { %v2123_v41 = vpop.f32.mrf.mxu1 }
 0x503   : > { %v1297_v50 = vld [vmem:[#allocation5] sm:$0xff] }
 0x504   : > { %v1303_v33 = vmul.f32 %v1301_v51, %v1297_v50 }
 0x507   : > { %v1623_v43 = vpop.f32.mrf.mxu1 }
 0x508   : > { %1630 = vrot.lane.b32.xlu0 %v1623_v43, %s2612_s28 }
 0x509   : > { %v2134_v44 = vpop.f32.mrf.mxu1 }
 0x50b   : > { %v1626_v46 = vpop.f32.mrf.mxu1 }
 0x50c   : > { %1654 = vperm.xlu0 %2295, %v2342_v32  }
 0x50d   : > { %v2135_v47 = vpop.f32.mrf.mxu1 }
 0x510   : > { %2298 = vset.pattern.permute.xlu0 %v2598_v60  ;;  %v1439_v60 = vpop.permute.xlu1 %1438 }
 0x511   : > { %1684 = vperm.xlu0 %2298, %v2342_v32  }
 0x514   : > { %v1577_v14 = vpop.permute.xlu1 %1576 }
 0x515   : > { %2301 = vset.pattern.permute.xlu0 %v2603_v22 }
 0x516   : > { %1714 = vperm.xlu0 %2301, %v2342_v32   ;;  %v2343_v32 = vld [vmem:[%s3221_s4] sm:$0xf] }
 0x517   : > { %v1728_v37 = vrot.slane %v2343_v32, %v1727_v20 }
 0x51c   : > { %v1355_v3 = vpop.permute.xlu0 %1354 }
 0x51d   : > { %v1357_v2 = vadd.f32 %v1355_v3, %v1303_v33 }
 0x51f   : > { %1359 = vst.msk [vmem:[#allocation5] sm:$0xff] %vm1358_vm4, %v1357_v2 }
 0x526   : > { %v1435_v30 = vld [vmem:[#allocation5] sm:$0xff] }
 0x527   : > { %v1441_v7 = vmul.f32 %v1439_v60, %v1435_v30 }
 0x565   : > { %v1645_v25 = vpop.permute.xlu1 %1644 }
 0x56a   : > { %v1665_v31 = vpop.permute.xlu1 %1664 }
 0x56e   : > { %v1493_v22 = vpop.permute.xlu0 %1492 }
 0x56f   : > { %v1495_v9 = vadd.f32 %v1493_v22, %v1441_v7  ;;  %v1675_v62 = vpop.permute.xlu1 %1674 }
 0x571   : > { %1497 = vst.msk [vmem:[#allocation5] sm:$0xff] %vm1496_vm5, %v1495_v9 }
 0x574   : > { %v1695_v1 = vpop.permute.xlu1 %1694 }
 0x578   : > { %v1573_v23 = vld [vmem:[#allocation5] sm:$0xff] }
 0x579   : > { %v1579_v35 = vmul.f32 %v1577_v14, %v1573_v23  ;;  %v1705_v12 = vpop.permute.xlu1 %1704 }
 0x57a   : > { %v1631_v61 = vpop.permute.xlu0 %1630 }
 0x57b   : > { %v1633_v24 = vadd.f32 %v1631_v61, %v1579_v35 }
 0x57d   : > { %1635 = vst.msk [vmem:[#allocation5] sm:$0xff] %vm1634_vm6, %v1633_v24 }
 0x584   : > { %v1641_v27 = vld [vmem:[#allocation5] sm:$0xff] }
 0x585   : > { %v1647_v0 = vmul.f32 %v1645_v25, %v1641_v27 }
 0x587   : > { %1648 = vst.msk [vmem:[#allocation5] sm:$0xff] %vm533_vm2, %v1647_v0  ;;  %v1655_v28 = vpop.permute.xlu0 %1654 }
 0x58c   : > { %v1685_v58 = vpop.permute.xlu0 %1684 }
 0x58e   : > { %v1651_v59 = vld [vmem:[#allocation5] sm:$0xff] }
 0x58f   : > { %v1657_v29 = vmul.f32 %v1655_v28, %v1651_v59 }
 0x591   : > { %1658 = vst.msk [vmem:[#allocation5] sm:$0xff] %vm806_vm14, %v1657_v29  ;;  %v1715_v38 = vpop.permute.xlu0 %1714 }
 0x598   : > { %v1661_v36 = vld [vmem:[#allocation5] sm:$0xff] }
 0x599   : > { %v1667_v53 = vmul.f32 %v1665_v31, %v1661_v36 }
 0x59b   : > { %1668 = vst.msk [vmem:[#allocation5] sm:$0xff] %vm944_vm15, %v1667_v53 }
 0x5a2   : > { %v1671_v18 = vld [vmem:[#allocation5] sm:$0xff] }
 0x5a3   : > { %v1677_v56 = vmul.f32 %v1675_v62, %v1671_v18 }
 0x5a5   : > { %1678 = vst.msk [vmem:[#allocation5] sm:$0xff] %vm1082_vm1, %v1677_v56 }
 0x5ac   : > { %v1681_v57 = vld [vmem:[#allocation5] sm:$0xff] }
 0x5ad   : > { %v1687_v63 = vmul.f32 %v1685_v58, %v1681_v57 }
 0x5af   : > { %1688 = vst.msk [vmem:[#allocation5] sm:$0xff] %vm1220_vm3, %v1687_v63 }
 0x5b6   : > { %v1691_v6 = vld [vmem:[#allocation5] sm:$0xff] }
 0x5b7   : > { %v1697_v8 = vmul.f32 %v1695_v1, %v1691_v6 }
 0x5b9   : > { %1698 = vst.msk [vmem:[#allocation5] sm:$0xff] %vm1358_vm4, %v1697_v8 }
 0x5c0   : > { %v1701_v13 = vld [vmem:[#allocation5] sm:$0xff] }
 0x5c1   : > { %v1707_v16 = vmul.f32 %v1705_v12, %v1701_v13 }
 0x5c3   : > { %1708 = vst.msk [vmem:[#allocation5] sm:$0xff] %vm1496_vm5, %v1707_v16 }
 0x5ca   : > { %v1711_v17 = vld [vmem:[#allocation5] sm:$0xff] }
 0x5cb   : > { %v1717_v39 = vmul.f32 %v1715_v38, %v1711_v17 }
 0x5cd   : > { %1718 = vst.msk [vmem:[#allocation5] sm:$0xff] %vm1634_vm6, %v1717_v39 }
 0x5d4   : > { %v1719_v4 = vld [vmem:[#allocation5] sm:$0xff] }
 0x5d5   : > { %v1720_v40 = vpack.c.bf16 %v1719_v4, %v1719_v4 }
 0x5d7   : > { %2141 = vmatmul.mubr.msk.bf16.vlgmr.msra.gmra.mxu0 %vm402_vm0, %v1720_v40 }
 0x697   : > { %v1778_v42 = vpop.f32.mrf.mxu0 }
 0x698   : > { %v1779_v45 = vadd.f32 %v1778_v42, %v1728_v37 }
 0x699   : > { %v2142_v10 = vpop.f32.mrf.mxu0 }
 0x69a   : > { %1784 = vst.msk [vmem:[%s373_s11] sm:$0xff] %vm402_vm0, %v1779_v45 }
 0x69b   : > { %v1781_v48 = vpop.f32.mrf.mxu0 }
 0x69c   : > { %2491 = shalt.err (!%p2488_p2)
}
 0x69d   : > { %s2492_s2 = scalar_lea.hbm %s3168_s27, 128  ;;  %s2496_s18 = scalar_lea.hbm %s3223_s6, 256 }
 0x69e   : > { %p2493_p4 = scmp.ne.s32.totalorder %s3168_s27, %s2492_s2  ;;  %p2497_p7 = scmp.lt.s32.totalorder %s3168_s27, %s3223_s6 }
 0x69f   : > { %p2498_p6 = scmp.lt.s32.totalorder %s2496_s18, %s2492_s2 }
 0x6a0   : > { %p2494_p1 = pnand %p2493_p4, %p2745_p5 }
 0x6a1   : > { %p2499_p12 = por %p2498_p6, %p2497_p7 }
 0x6a2   : > { %p2495_p8 = pneg %p2494_p1 }
 0x6a4   : > { %p2500_p0 = pnand %p2499_p12, %p2495_p8 }
 0x6a6   : > { %2503 = shalt.err (!%p2500_p0)
}
 0x6a7   : > { %2160 = dma.vmem_to_hbm [thread:$0]  (%p2745_p5), %s3170_s7, 128, %s3168_s27, %s1786_s29   ;;  %v2143_v49 = vpop.f32.mrf.mxu0 }
 0x6a8 PF: > { %s1812_s9 = sand.u32 1, %s2550_s21   ;;  %p3246_p3 = scmp.ne.s32.totalorder %s3231_s30, 0 }
 0x6a9   : > { %p3247_p10 = scmp.ge.s32.totalorder %s2570_s26, 2  ;;  %s1813_s0 = scalar_lea.sflag [#allocation8], %s1812_s9 }
 0x6ab   : > { %p2180_p11 = pnand %p3247_p10, %p3246_p3 }
 0x6ad   : > { %p2181_p9 = pneg %p2180_p11 }
 0x6af   : > { %2545 = dma.done.wait (%p2181_p9), %s1813_s0, 128  }
 0x6b0   : > { %2547 = vsyncadd (%p2181_p9), %s1813_s0, 4294967168  ;;  %s26_s26 = sadd.s32 1, %s2570_s26   ;;  %s3248_s21 = smov %s2554_s22 }
 0x6b1   : > { %p23_p13 = scmp.ge.s32.totalorder %s26_s26, 4   ;;  %s3249_s22 = smov %s2558_s23 }
 0x6b2   : > { %s3250_s23 = smov %s2757_s17  ;;  %s3251_s24 = smov %s2566_s25 }
 0x6b3   : > { %s3252_s25 = smov %s3254_s15  ;;  %25 = sbr.rel (!%p23_p13) target bundleno = 14 (0xe), region = 122 }
 0x6b8   :  { %1818 = vsyncpa [#allocation7], 1 }
 0x6b9   :  { %1820 = vsyncpa [#allocation7 + $0x1], 1 }
 0x6ba   :  { %1821 = vsyncpa [#allocation10], 1 }
 0x6bb   :  { %1823 = vsyncpa [#allocation10 + $0x1], 1 }
 0x6bc   :  { %1824 = vsyncpa [#allocation13], 1 }
 0x6bd   :  { %1825 = vsyncpa [#allocation8], 1 }
 0x6be   :  { %1827 = vsyncpa [#allocation8 + $0x1], 1 }

</bundles_post_ra>
